<compile_context>
chip_gen: v6e
topology: v6e:2x2x1
jax: 0.10.0
libtpu: 0.0.40
codegen_flags: <defaults>
</compile_context>

<pallas_src>
import functools

import jax
import jax.numpy as jnp
from jax import lax
from jax.experimental import pallas as pl
from jax.experimental.pallas import tpu as pltpu


def rope_mha_kernel(xq_ref, xk_ref, xv_ref,
                    wq_ref, bq_ref, wk_ref, bk_ref, wv_ref, bv_ref,
                    wo_ref, bo_ref, cos_ref, sin_ref,
                    o_ref, ctx_ref,
                    *, heads_per_block, head_dim):
    """One grid step = (one batch element, one block of `heads_per_block` heads).

    Context columns for the head block are written into the bf16 (S, E) slab
    `ctx_ref`; the single output projection (K = E) runs at the last head block
    directly into the resident output block.
    """
    hb = pl.program_id(1)
    HB = heads_per_block
    D = head_dim
    half = D // 2
    HBD = HB * D

    xq = xq_ref[0]                    # (S, E) bf16
    xk = xk_ref[0]
    xv = xv_ref[0]

    # Per head-block projections: bf16 operands, f32 accumulation + f32 bias.
    # Weights are pre-transposed to [in, out] on the host (heads contiguous
    # along columns); 1/sqrt(D) is folded into wq/bq on the host.
    qh = jnp.dot(xq, wq_ref[...], preferred_element_type=jnp.float32) + bq_ref[...]   # (S, HBD)
    kh = jnp.dot(xk, wk_ref[...], preferred_element_type=jnp.float32) + bk_ref[...]   # (S, HBD)
    vh = (jnp.dot(xv, wv_ref[...], preferred_element_type=jnp.float32)
          + bv_ref[...]).astype(jnp.bfloat16)                                         # (S, HBD)

    cos = cos_ref[...]                # (S, D/2) f32
    sin = sin_ref[...]                # (S, D/2) f32

    dn = (((1,), (1,)), ((), ()))     # contract last dims of both operands (A @ B^T)

    ctx_cols = []
    for h in range(HB):               # short, static head loop (unrolled)
        q_h = qh[:, h * D:(h + 1) * D]
        k_h = kh[:, h * D:(h + 1) * D]
        v_h = vh[:, h * D:(h + 1) * D]

        # RoPE (rotate_half convention) in f32, assembled to full width so the
        # score matmul contracts the full D depth in a single MXU pass.
        q1, q2 = q_h[:, :half], q_h[:, half:]
        k1, k2 = k_h[:, :half], k_h[:, half:]
        rq = jnp.concatenate([q1 * cos - q2 * sin,
                              q2 * cos + q1 * sin], axis=-1).astype(jnp.bfloat16)
        rk = jnp.concatenate([k1 * cos - k2 * sin,
                              k2 * cos + k1 * sin], axis=-1).astype(jnp.bfloat16)

        scores = lax.dot_general(rq, rk, dn, preferred_element_type=jnp.float32)  # (S, S)

        # Numerically-stable softmax in f32; divide on the EUP (approx recip).
        scores = scores - jnp.max(scores, axis=-1, keepdims=True)
        p = jnp.exp(scores)
        attn = (p * pl.reciprocal(jnp.sum(p, axis=-1, keepdims=True),
                                  approx=True)).astype(jnp.bfloat16)

        ctx_cols.append(jnp.dot(attn, v_h, preferred_element_type=jnp.float32))   # (S, D)

    ctx_blk = jnp.concatenate(ctx_cols, axis=-1).astype(jnp.bfloat16)              # (S, HBD)

    if HBD == ctx_ref.shape[1]:
        # Single head block covers all heads -> full-width (lane-dense) store.
        ctx_ref[...] = ctx_blk
    else:
        col0 = pl.multiple_of(hb * HBD, HBD)
        ctx_ref[:, pl.ds(col0, HBD)] = ctx_blk

    # Output projection once per batch element, as one deep-K (K = E) matmul,
    # written directly into the resident output block (no f32 accumulator).
    @pl.when(hb == pl.num_programs(1) - 1)
    def _():
        o_ref[0] = (jnp.dot(ctx_ref[...], wo_ref[...],
                            preferred_element_type=jnp.float32)
                    + bo_ref[...]).astype(o_ref.dtype)


def rope_mha_forward(query, key, value, params, num_heads, *, heads_per_block=None):
    """Pallas wrapper. query/key/value: [B, S, E]; params in PyTorch layout."""
    B, Sq, E = query.shape
    _, Sk, _ = key.shape
    assert Sq == Sk, "TODO(synk): distinct seq_len_q / seq_len_k not wired in"
    S = Sq
    H = num_heads
    D = E // H
    assert D * H == E and D % 2 == 0
    half = D // 2
    scale = 1.0 / float(D) ** 0.5

    # Pick the largest divisor of H such that the per-step matmul width
    # HB*D targets ~256 lanes (MXU width on v6e/v7x).
    if heads_per_block is None:
        target = max(1, 256 // D)
        heads_per_block = 1
        for c in range(1, H + 1):
            if H % c == 0 and c <= target:
                heads_per_block = c
    HB = heads_per_block
    if (HB * D) % 128 != 0 and HB != H:
        HB = H                       # keep weight blocks lane-aligned or full-width
    assert H % HB == 0
    n_hblocks = H // HB
    HBD = HB * D

    wq, bq, wk, bk, wv, bv, wo, bo = params
    f32, bf16 = jnp.float32, jnp.bfloat16

    # Host-side (one-time) weight prep: transpose to [in, out] (heads are then
    # contiguous column blocks), fold the attention scale into the Q
    # projection, cast matmul operands to bf16 (biases stay f32 and are added
    # to the f32 accumulator).
    wq_t = (wq.T * scale).astype(bf16)            # (E, E)
    bq_2 = (bq * scale).reshape(1, E).astype(f32)
    wk_t = wk.T.astype(bf16)
    bk_2 = bk.reshape(1, E).astype(f32)
    wv_t = wv.T.astype(bf16)
    bv_2 = bv.reshape(1, E).astype(f32)
    wo_t = wo.T.astype(bf16)                      # (E, E)
    bo_2 = bo.reshape(1, E).astype(f32)

    # Half-width RoPE tables (S, D/2), rotate_half convention, f32.
    inv_freq = 1.0 / (10000.0 ** (jnp.arange(0, D, 2, dtype=f32) / D))
    pos = jnp.arange(S, dtype=f32)
    angles = pos[:, None] * inv_freq[None, :]
    cos_tab = jnp.cos(angles)
    sin_tab = jnp.sin(angles)

    # Activations as bf16 (halves DMA + VMEM; matmul accumulation stays f32).
    xq = query.astype(bf16)
    xk = key.astype(bf16)
    xv = value.astype(bf16)

    act_spec = pl.BlockSpec((1, S, E), lambda b, h: (b, 0, 0))
    w_in_spec = pl.BlockSpec((E, HBD), lambda b, h: (0, h))
    b_in_spec = pl.BlockSpec((1, HBD), lambda b, h: (0, h))
    wo_spec = pl.BlockSpec((E, E), lambda b, h: (0, 0))
    bo_spec = pl.BlockSpec((1, E), lambda b, h: (0, 0))
    tab_spec = pl.BlockSpec((S, half), lambda b, h: (0, 0))

    # Per-generation VMEM budget: ~3/4 of physical capacity, capped at 100 MiB
    # (=> ~48 MiB on v7x's 64 MiB, ~96-100 MiB on v5e/v6e's 128 MiB).
    try:
        vmem_cap = pltpu.get_tpu_info().vmem_capacity_bytes
    except Exception:
        vmem_cap = 64 * 1024 * 1024
    vmem_limit = int(min(100 * 1024 * 1024, (vmem_cap * 3) // 4))

    kernel = functools.partial(rope_mha_kernel,
                               heads_per_block=HB, head_dim=D)

    return pl.pallas_call(
        kernel,
        out_shape=jax.ShapeDtypeStruct((B, S, E), f32),
        grid=(B, n_hblocks),
        in_specs=[act_spec, act_spec, act_spec,
                  w_in_spec, b_in_spec,
                  w_in_spec, b_in_spec,
                  w_in_spec, b_in_spec,
                  wo_spec, bo_spec,
                  tab_spec, tab_spec],
        out_specs=act_spec,
        scratch_shapes=[pltpu.VMEM((S, E), bf16)],   # bf16 context slab
        compiler_params=pltpu.CompilerParams(
            # Batch is megacore-parallel; the head-block axis carries the
            # resident output / context slab so it must stay "arbitrary".
            # TODO(synk): add a query-tile "parallel" axis for B==1 on v7x.
            dimension_semantics=("parallel", "arbitrary"),
            vmem_limit_bytes=vmem_limit),
    )(xq, xk, xv,
      wq_t, bq_2, wk_t, bk_2, wv_t, bv_2,
      wo_t, bo_2, cos_tab, sin_tab)


def _reference_forward(query, key, value, params, num_heads):
    """Pure-JAX f32 reference reproducing the PyTorch module (eval, no mask)."""
    B, S, E = query.shape
    D = E // num_heads
    wq, bq, wk, bk, wv, bv, wo, bo = params

    inv_freq = 1.0 / (10000.0 ** (jnp.arange(0, D, 2, dtype=jnp.float32) / D))
    pos = jnp.arange(S, dtype=jnp.float32)
    angles = pos[:, None] * inv_freq[None, :]
    cos = jnp.concatenate([jnp.cos(angles), jnp.cos(angles)], axis=-1)  # (S, D)
    sin = jnp.concatenate([jnp.sin(angles), jnp.sin(angles)], axis=-1)

    def lin(x, w, b):
        return x @ w.T + b

    q = lin(query, wq, bq).reshape(B, S, num_heads, D)
    k = lin(key, wk, bk).reshape(B, S, num_heads, D)
    v = lin(value, wv, bv).reshape(B, S, num_heads, D)

    def rot_half(x):
        x1, x2 = jnp.split(x, 2, axis=-1)
        return jnp.concatenate([-x2, x1], axis=-1)

    c = cos[None, :, None, :]
    s = sin[None, :, None, :]
    q = q * c + rot_half(q) * s
    k = k * c + rot_half(k) * s

    q = q.transpose(0, 2, 1, 3)
    k = k.transpose(0, 2, 1, 3)
    v = v.transpose(0, 2, 1, 3)

    scores = jnp.einsum("bhqd,bhkd->bhqk", q, k) / jnp.sqrt(jnp.float32(D))
    attn = jax.nn.softmax(scores, axis=-1)
    ctx = jnp.einsum("bhqk,bhkd->bhqd", attn, v)
    ctx = ctx.transpose(0, 2, 1, 3).reshape(B, S, E)
    return lin(ctx, wo, bo)


def _init_linear(key, out_f, in_f):
    kw, kb = jax.random.split(key)
    bound = 1.0 / jnp.sqrt(jnp.float32(in_f))
    w = jax.random.uniform(kw, (out_f, in_f), jnp.float32, -bound, bound)
    b = jax.random.uniform(kb, (out_f,), jnp.float32, -bound, bound)
    return w, b


if __name__ == "__main__":
    B, S, E, H = 2, 8, 32, 4   # batch, seq, embed_dim, num_heads (head_dim = 8)

    root = jax.random.PRNGKey(0)
    k_q, k_k, k_v, k_o, k_in = jax.random.split(root, 5)

    wq, bq = _init_linear(k_q, E, E)
    wk, bk = _init_linear(k_k, E, E)
    wv, bv = _init_linear(k_v, E, E)
    wo, bo = _init_linear(k_o, E, E)
    params = (wq, bq, wk, bk, wv, bv, wo, bo)

    kq_in, kk_in, kv_in = jax.random.split(k_in, 3)
    query = jax.random.normal(kq_in, (B, S, E), jnp.float32)
    key_t = jax.random.normal(kk_in, (B, S, E), jnp.float32)
    value = jax.random.normal(kv_in, (B, S, E), jnp.float32)

    out = rope_mha_forward(query, key_t, value, params, H)
    out = jax.block_until_ready(out)

    ref = _reference_forward(query, key_t, value, params, H)
    assert out.shape == (B, S, E)
    # Tolerance accounts for bf16 MXU operands (f32 accumulation) and the
    # approximate (EUP) reciprocal in the softmax; expected max err ~3e-3.
    assert jnp.allclose(out, ref, atol=2e-2, rtol=2e-2), \
        f"max abs err {jnp.max(jnp.abs(out - ref))}"

    print("KERNEL_OK")
</pallas_src>

<mosaic_0001>
module attributes {stable_mosaic.version = 11 : i64} {
  func.func @rope_mha_kernel(%arg0: i32, %arg1: i32, %arg2: memref<1x8x32xbf16, #tpu.memory_space<vmem>>, %arg3: memref<1x8x32xbf16, #tpu.memory_space<vmem>>, %arg4: memref<1x8x32xbf16, #tpu.memory_space<vmem>>, %arg5: memref<32x32xbf16, #tpu.memory_space<vmem>>, %arg6: memref<1x32xf32, #tpu.memory_space<vmem>>, %arg7: memref<32x32xbf16, #tpu.memory_space<vmem>>, %arg8: memref<1x32xf32, #tpu.memory_space<vmem>>, %arg9: memref<32x32xbf16, #tpu.memory_space<vmem>>, %arg10: memref<1x32xf32, #tpu.memory_space<vmem>>, %arg11: memref<32x32xbf16, #tpu.memory_space<vmem>>, %arg12: memref<1x32xf32, #tpu.memory_space<vmem>>, %arg13: memref<8x4xf32, #tpu.memory_space<vmem>>, %arg14: memref<8x4xf32, #tpu.memory_space<vmem>>, %arg15: memref<1x8x32xf32, #tpu.memory_space<vmem>>, %arg16: memref<8x32xbf16, #tpu.memory_space<vmem>>) attributes {dimension_semantics = [#tpu.dimension_semantics<parallel>, #tpu.dimension_semantics<arbitrary>], iteration_bounds = array<i64: 2, 1>, scalar_prefetch = 0 : i64, scratch_operands = 1 : i64, tpu.core_type = #tpu.core_type<tc>, window_params = [{transform_indices = @transform_0, window_bounds = array<i64: 1, 8, 32>}, {transform_indices = @transform_1, window_bounds = array<i64: 1, 8, 32>}, {transform_indices = @transform_2, window_bounds = array<i64: 1, 8, 32>}, {transform_indices = @transform_3, window_bounds = array<i64: 32, 32>}, {transform_indices = @transform_4, window_bounds = array<i64: 1, 32>}, {transform_indices = @transform_5, window_bounds = array<i64: 32, 32>}, {transform_indices = @transform_6, window_bounds = array<i64: 1, 32>}, {transform_indices = @transform_7, window_bounds = array<i64: 32, 32>}, {transform_indices = @transform_8, window_bounds = array<i64: 1, 32>}, {pipeline_mode = #tpu.pipeline_mode<synchronous>, transform_indices = @transform_9, window_bounds = array<i64: 32, 32>}, {pipeline_mode = #tpu.pipeline_mode<synchronous>, transform_indices = @transform_10, window_bounds = array<i64: 1, 32>}, {pipeline_mode = #tpu.pipeline_mode<synchronous>, transform_indices = @transform_11, window_bounds = array<i64: 8, 4>}, {pipeline_mode = #tpu.pipeline_mode<synchronous>, transform_indices = @transform_12, window_bounds = array<i64: 8, 4>}, {transform_indices = @transform_13, window_bounds = array<i64: 1, 8, 32>}]} {
    %c0 = arith.constant 0 : index
    %c0_0 = arith.constant 0 : index
    %c0_1 = arith.constant 0 : index
    %0 = vector.load %arg2[%c0, %c0_0, %c0_1] : memref<1x8x32xbf16, #tpu.memory_space<vmem>>, vector<1x8x32xbf16>
    %1 = vector.shape_cast %0 : vector<1x8x32xbf16> to vector<8x32xbf16>
    %c0_2 = arith.constant 0 : index
    %c0_3 = arith.constant 0 : index
    %c0_4 = arith.constant 0 : index
    %2 = vector.load %arg3[%c0_2, %c0_3, %c0_4] : memref<1x8x32xbf16, #tpu.memory_space<vmem>>, vector<1x8x32xbf16>
    %3 = vector.shape_cast %2 : vector<1x8x32xbf16> to vector<8x32xbf16>
    %c0_5 = arith.constant 0 : index
    %c0_6 = arith.constant 0 : index
    %c0_7 = arith.constant 0 : index
    %4 = vector.load %arg4[%c0_5, %c0_6, %c0_7] : memref<1x8x32xbf16, #tpu.memory_space<vmem>>, vector<1x8x32xbf16>
    %5 = vector.shape_cast %4 : vector<1x8x32xbf16> to vector<8x32xbf16>
    %c0_8 = arith.constant 0 : index
    %c0_9 = arith.constant 0 : index
    %6 = vector.load %arg5[%c0_8, %c0_9] : memref<32x32xbf16, #tpu.memory_space<vmem>>, vector<32x32xbf16>
    %cst = arith.constant dense<0.000000e+00> : vector<8x32xf32>
    %7 = tpu.matmul %1, %6, %cst {dimension_numbers = #tpu.dot_dimension_numbers<[1], [0], [0], [1], [0, 0, 1, 1], [], []>} : vector<8x32xbf16>, vector<32x32xbf16>, vector<8x32xf32> -> vector<8x32xf32>
    %c0_10 = arith.constant 0 : index
    %c0_11 = arith.constant 0 : index
    %8 = vector.load %arg6[%c0_10, %c0_11] : memref<1x32xf32, #tpu.memory_space<vmem>>, vector<1x32xf32>
    %9 = vector.broadcast %8 : vector<1x32xf32> to vector<8x32xf32>
    %10 = arith.addf %7, %9 : vector<8x32xf32>
    %c0_12 = arith.constant 0 : index
    %c0_13 = arith.constant 0 : index
    %11 = vector.load %arg7[%c0_12, %c0_13] : memref<32x32xbf16, #tpu.memory_space<vmem>>, vector<32x32xbf16>
    %cst_14 = arith.constant dense<0.000000e+00> : vector<8x32xf32>
    %12 = tpu.matmul %3, %11, %cst_14 {dimension_numbers = #tpu.dot_dimension_numbers<[1], [0], [0], [1], [0, 0, 1, 1], [], []>} : vector<8x32xbf16>, vector<32x32xbf16>, vector<8x32xf32> -> vector<8x32xf32>
    %c0_15 = arith.constant 0 : index
    %c0_16 = arith.constant 0 : index
    %13 = vector.load %arg8[%c0_15, %c0_16] : memref<1x32xf32, #tpu.memory_space<vmem>>, vector<1x32xf32>
    %14 = vector.broadcast %13 : vector<1x32xf32> to vector<8x32xf32>
    %15 = arith.addf %12, %14 : vector<8x32xf32>
    %c0_17 = arith.constant 0 : index
    %c0_18 = arith.constant 0 : index
    %16 = vector.load %arg9[%c0_17, %c0_18] : memref<32x32xbf16, #tpu.memory_space<vmem>>, vector<32x32xbf16>
    %cst_19 = arith.constant dense<0.000000e+00> : vector<8x32xf32>
    %17 = tpu.matmul %5, %16, %cst_19 {dimension_numbers = #tpu.dot_dimension_numbers<[1], [0], [0], [1], [0, 0, 1, 1], [], []>} : vector<8x32xbf16>, vector<32x32xbf16>, vector<8x32xf32> -> vector<8x32xf32>
    %c0_20 = arith.constant 0 : index
    %c0_21 = arith.constant 0 : index
    %18 = vector.load %arg10[%c0_20, %c0_21] : memref<1x32xf32, #tpu.memory_space<vmem>>, vector<1x32xf32>
    %19 = vector.broadcast %18 : vector<1x32xf32> to vector<8x32xf32>
    %20 = arith.addf %17, %19 : vector<8x32xf32>
    %21 = arith.truncf %20 : vector<8x32xf32> to vector<8x32xbf16>
    %c0_22 = arith.constant 0 : index
    %c0_23 = arith.constant 0 : index
    %22 = vector.load %arg13[%c0_22, %c0_23] : memref<8x4xf32, #tpu.memory_space<vmem>>, vector<8x4xf32>
    %c0_24 = arith.constant 0 : index
    %c0_25 = arith.constant 0 : index
    %23 = vector.load %arg14[%c0_24, %c0_25] : memref<8x4xf32, #tpu.memory_space<vmem>>, vector<8x4xf32>
    %24 = vector.extract_strided_slice %10 {offsets = [0, 0], sizes = [8, 8], strides = [1, 1]} : vector<8x32xf32> to vector<8x8xf32>
    %25 = vector.extract_strided_slice %15 {offsets = [0, 0], sizes = [8, 8], strides = [1, 1]} : vector<8x32xf32> to vector<8x8xf32>
    %26 = vector.extract_strided_slice %21 {offsets = [0, 0], sizes = [8, 8], strides = [1, 1]} : vector<8x32xbf16> to vector<8x8xbf16>
    %27 = vector.extract_strided_slice %24 {offsets = [0, 0], sizes = [8, 4], strides = [1, 1]} : vector<8x8xf32> to vector<8x4xf32>
    %28 = vector.extract_strided_slice %24 {offsets = [0, 4], sizes = [8, 4], strides = [1, 1]} : vector<8x8xf32> to vector<8x4xf32>
    %29 = vector.extract_strided_slice %25 {offsets = [0, 0], sizes = [8, 4], strides = [1, 1]} : vector<8x8xf32> to vector<8x4xf32>
    %30 = vector.extract_strided_slice %25 {offsets = [0, 4], sizes = [8, 4], strides = [1, 1]} : vector<8x8xf32> to vector<8x4xf32>
    %31 = arith.mulf %27, %22 : vector<8x4xf32>
    %32 = arith.mulf %28, %23 : vector<8x4xf32>
    %33 = arith.subf %31, %32 : vector<8x4xf32>
    %34 = arith.mulf %28, %22 : vector<8x4xf32>
    %35 = arith.mulf %27, %23 : vector<8x4xf32>
    %36 = arith.addf %34, %35 : vector<8x4xf32>
    %37 = tpu.concatenate %33, %36 in 1 : vector<8x4xf32>, vector<8x4xf32> -> vector<8x8xf32>
    %38 = arith.truncf %37 : vector<8x8xf32> to vector<8x8xbf16>
    %39 = arith.mulf %29, %22 : vector<8x4xf32>
    %40 = arith.mulf %30, %23 : vector<8x4xf32>
    %41 = arith.subf %39, %40 : vector<8x4xf32>
    %42 = arith.mulf %30, %22 : vector<8x4xf32>
    %43 = arith.mulf %29, %23 : vector<8x4xf32>
    %44 = arith.addf %42, %43 : vector<8x4xf32>
    %45 = tpu.concatenate %41, %44 in 1 : vector<8x4xf32>, vector<8x4xf32> -> vector<8x8xf32>
    %46 = arith.truncf %45 : vector<8x8xf32> to vector<8x8xbf16>
    %cst_26 = arith.constant dense<0.000000e+00> : vector<8x8xf32>
    %47 = tpu.matmul %38, %46, %cst_26 {dimension_numbers = #tpu.dot_dimension_numbers<[1], [1], [0], [0], [0, 0, 1, 0], [], []>} : vector<8x8xbf16>, vector<8x8xbf16>, vector<8x8xf32> -> vector<8x8xf32>
    %cst_27 = arith.constant dense<0xFF800000> : vector<8xf32>
    %48 = vector.multi_reduction <maximumf>, %47, %cst_27 [1] : vector<8x8xf32> to vector<8xf32>
    %49 = vector.shape_cast %48 : vector<8xf32> to vector<8x1xf32>
    %50 = vector.broadcast %49 : vector<8x1xf32> to vector<8x8xf32>
    %51 = arith.subf %47, %50 : vector<8x8xf32>
    %52 = math.exp %51 : vector<8x8xf32>
    %cst_28 = arith.constant dense<0.000000e+00> : vector<8xf32>
    %53 = vector.multi_reduction <add>, %52, %cst_28 [1] : vector<8x8xf32> to vector<8xf32>
    %54 = vector.shape_cast %53 : vector<8xf32> to vector<8x1xf32>
    %55 = tpu.reciprocal %54 {approx = true} : vector<8x1xf32> -> vector<8x1xf32>
    %56 = vector.broadcast %55 : vector<8x1xf32> to vector<8x8xf32>
    %57 = arith.mulf %52, %56 : vector<8x8xf32>
    %58 = arith.truncf %57 : vector<8x8xf32> to vector<8x8xbf16>
    %cst_29 = arith.constant dense<0.000000e+00> : vector<8x8xf32>
    %59 = tpu.matmul %58, %26, %cst_29 {dimension_numbers = #tpu.dot_dimension_numbers<[1], [0], [0], [1], [0, 0, 1, 1], [], []>} : vector<8x8xbf16>, vector<8x8xbf16>, vector<8x8xf32> -> vector<8x8xf32>
    %60 = vector.extract_strided_slice %10 {offsets = [0, 8], sizes = [8, 8], strides = [1, 1]} : vector<8x32xf32> to vector<8x8xf32>
    %61 = vector.extract_strided_slice %15 {offsets = [0, 8], sizes = [8, 8], strides = [1, 1]} : vector<8x32xf32> to vector<8x8xf32>
    %62 = vector.extract_strided_slice %21 {offsets = [0, 8], sizes = [8, 8], strides = [1, 1]} : vector<8x32xbf16> to vector<8x8xbf16>
    %63 = vector.extract_strided_slice %60 {offsets = [0, 0], sizes = [8, 4], strides = [1, 1]} : vector<8x8xf32> to vector<8x4xf32>
    %64 = vector.extract_strided_slice %60 {offsets = [0, 4], sizes = [8, 4], strides = [1, 1]} : vector<8x8xf32> to vector<8x4xf32>
    %65 = vector.extract_strided_slice %61 {offsets = [0, 0], sizes = [8, 4], strides = [1, 1]} : vector<8x8xf32> to vector<8x4xf32>
    %66 = vector.extract_strided_slice %61 {offsets = [0, 4], sizes = [8, 4], strides = [1, 1]} : vector<8x8xf32> to vector<8x4xf32>
    %67 = arith.mulf %63, %22 : vector<8x4xf32>
    %68 = arith.mulf %64, %23 : vector<8x4xf32>
    %69 = arith.subf %67, %68 : vector<8x4xf32>
    %70 = arith.mulf %64, %22 : vector<8x4xf32>
    %71 = arith.mulf %63, %23 : vector<8x4xf32>
    %72 = arith.addf %70, %71 : vector<8x4xf32>
    %73 = tpu.concatenate %69, %72 in 1 : vector<8x4xf32>, vector<8x4xf32> -> vector<8x8xf32>
    %74 = arith.truncf %73 : vector<8x8xf32> to vector<8x8xbf16>
    %75 = arith.mulf %65, %22 : vector<8x4xf32>
    %76 = arith.mulf %66, %23 : vector<8x4xf32>
    %77 = arith.subf %75, %76 : vector<8x4xf32>
    %78 = arith.mulf %66, %22 : vector<8x4xf32>
    %79 = arith.mulf %65, %23 : vector<8x4xf32>
    %80 = arith.addf %78, %79 : vector<8x4xf32>
    %81 = tpu.concatenate %77, %80 in 1 : vector<8x4xf32>, vector<8x4xf32> -> vector<8x8xf32>
    %82 = arith.truncf %81 : vector<8x8xf32> to vector<8x8xbf16>
    %cst_30 = arith.constant dense<0.000000e+00> : vector<8x8xf32>
    %83 = tpu.matmul %74, %82, %cst_30 {dimension_numbers = #tpu.dot_dimension_numbers<[1], [1], [0], [0], [0, 0, 1, 0], [], []>} : vector<8x8xbf16>, vector<8x8xbf16>, vector<8x8xf32> -> vector<8x8xf32>
    %cst_31 = arith.constant dense<0xFF800000> : vector<8xf32>
    %84 = vector.multi_reduction <maximumf>, %83, %cst_31 [1] : vector<8x8xf32> to vector<8xf32>
    %85 = vector.shape_cast %84 : vector<8xf32> to vector<8x1xf32>
    %86 = vector.broadcast %85 : vector<8x1xf32> to vector<8x8xf32>
    %87 = arith.subf %83, %86 : vector<8x8xf32>
    %88 = math.exp %87 : vector<8x8xf32>
    %cst_32 = arith.constant dense<0.000000e+00> : vector<8xf32>
    %89 = vector.multi_reduction <add>, %88, %cst_32 [1] : vector<8x8xf32> to vector<8xf32>
    %90 = vector.shape_cast %89 : vector<8xf32> to vector<8x1xf32>
    %91 = tpu.reciprocal %90 {approx = true} : vector<8x1xf32> -> vector<8x1xf32>
    %92 = vector.broadcast %91 : vector<8x1xf32> to vector<8x8xf32>
    %93 = arith.mulf %88, %92 : vector<8x8xf32>
    %94 = arith.truncf %93 : vector<8x8xf32> to vector<8x8xbf16>
    %cst_33 = arith.constant dense<0.000000e+00> : vector<8x8xf32>
    %95 = tpu.matmul %94, %62, %cst_33 {dimension_numbers = #tpu.dot_dimension_numbers<[1], [0], [0], [1], [0, 0, 1, 1], [], []>} : vector<8x8xbf16>, vector<8x8xbf16>, vector<8x8xf32> -> vector<8x8xf32>
    %96 = vector.extract_strided_slice %10 {offsets = [0, 16], sizes = [8, 8], strides = [1, 1]} : vector<8x32xf32> to vector<8x8xf32>
    %97 = vector.extract_strided_slice %15 {offsets = [0, 16], sizes = [8, 8], strides = [1, 1]} : vector<8x32xf32> to vector<8x8xf32>
    %98 = vector.extract_strided_slice %21 {offsets = [0, 16], sizes = [8, 8], strides = [1, 1]} : vector<8x32xbf16> to vector<8x8xbf16>
    %99 = vector.extract_strided_slice %96 {offsets = [0, 0], sizes = [8, 4], strides = [1, 1]} : vector<8x8xf32> to vector<8x4xf32>
    %100 = vector.extract_strided_slice %96 {offsets = [0, 4], sizes = [8, 4], strides = [1, 1]} : vector<8x8xf32> to vector<8x4xf32>
    %101 = vector.extract_strided_slice %97 {offsets = [0, 0], sizes = [8, 4], strides = [1, 1]} : vector<8x8xf32> to vector<8x4xf32>
    %102 = vector.extract_strided_slice %97 {offsets = [0, 4], sizes = [8, 4], strides = [1, 1]} : vector<8x8xf32> to vector<8x4xf32>
    %103 = arith.mulf %99, %22 : vector<8x4xf32>
    %104 = arith.mulf %100, %23 : vector<8x4xf32>
    %105 = arith.subf %103, %104 : vector<8x4xf32>
    %106 = arith.mulf %100, %22 : vector<8x4xf32>
    %107 = arith.mulf %99, %23 : vector<8x4xf32>
    %108 = arith.addf %106, %107 : vector<8x4xf32>
    %109 = tpu.concatenate %105, %108 in 1 : vector<8x4xf32>, vector<8x4xf32> -> vector<8x8xf32>
    %110 = arith.truncf %109 : vector<8x8xf32> to vector<8x8xbf16>
    %111 = arith.mulf %101, %22 : vector<8x4xf32>
    %112 = arith.mulf %102, %23 : vector<8x4xf32>
    %113 = arith.subf %111, %112 : vector<8x4xf32>
    %114 = arith.mulf %102, %22 : vector<8x4xf32>
    %115 = arith.mulf %101, %23 : vector<8x4xf32>
    %116 = arith.addf %114, %115 : vector<8x4xf32>
    %117 = tpu.concatenate %113, %116 in 1 : vector<8x4xf32>, vector<8x4xf32> -> vector<8x8xf32>
    %118 = arith.truncf %117 : vector<8x8xf32> to vector<8x8xbf16>
    %cst_34 = arith.constant dense<0.000000e+00> : vector<8x8xf32>
    %119 = tpu.matmul %110, %118, %cst_34 {dimension_numbers = #tpu.dot_dimension_numbers<[1], [1], [0], [0], [0, 0, 1, 0], [], []>} : vector<8x8xbf16>, vector<8x8xbf16>, vector<8x8xf32> -> vector<8x8xf32>
    %cst_35 = arith.constant dense<0xFF800000> : vector<8xf32>
    %120 = vector.multi_reduction <maximumf>, %119, %cst_35 [1] : vector<8x8xf32> to vector<8xf32>
    %121 = vector.shape_cast %120 : vector<8xf32> to vector<8x1xf32>
    %122 = vector.broadcast %121 : vector<8x1xf32> to vector<8x8xf32>
    %123 = arith.subf %119, %122 : vector<8x8xf32>
    %124 = math.exp %123 : vector<8x8xf32>
    %cst_36 = arith.constant dense<0.000000e+00> : vector<8xf32>
    %125 = vector.multi_reduction <add>, %124, %cst_36 [1] : vector<8x8xf32> to vector<8xf32>
    %126 = vector.shape_cast %125 : vector<8xf32> to vector<8x1xf32>
    %127 = tpu.reciprocal %126 {approx = true} : vector<8x1xf32> -> vector<8x1xf32>
    %128 = vector.broadcast %127 : vector<8x1xf32> to vector<8x8xf32>
    %129 = arith.mulf %124, %128 : vector<8x8xf32>
    %130 = arith.truncf %129 : vector<8x8xf32> to vector<8x8xbf16>
    %cst_37 = arith.constant dense<0.000000e+00> : vector<8x8xf32>
    %131 = tpu.matmul %130, %98, %cst_37 {dimension_numbers = #tpu.dot_dimension_numbers<[1], [0], [0], [1], [0, 0, 1, 1], [], []>} : vector<8x8xbf16>, vector<8x8xbf16>, vector<8x8xf32> -> vector<8x8xf32>
    %132 = vector.extract_strided_slice %10 {offsets = [0, 24], sizes = [8, 8], strides = [1, 1]} : vector<8x32xf32> to vector<8x8xf32>
    %133 = vector.extract_strided_slice %15 {offsets = [0, 24], sizes = [8, 8], strides = [1, 1]} : vector<8x32xf32> to vector<8x8xf32>
    %134 = vector.extract_strided_slice %21 {offsets = [0, 24], sizes = [8, 8], strides = [1, 1]} : vector<8x32xbf16> to vector<8x8xbf16>
    %135 = vector.extract_strided_slice %132 {offsets = [0, 0], sizes = [8, 4], strides = [1, 1]} : vector<8x8xf32> to vector<8x4xf32>
    %136 = vector.extract_strided_slice %132 {offsets = [0, 4], sizes = [8, 4], strides = [1, 1]} : vector<8x8xf32> to vector<8x4xf32>
    %137 = vector.extract_strided_slice %133 {offsets = [0, 0], sizes = [8, 4], strides = [1, 1]} : vector<8x8xf32> to vector<8x4xf32>
    %138 = vector.extract_strided_slice %133 {offsets = [0, 4], sizes = [8, 4], strides = [1, 1]} : vector<8x8xf32> to vector<8x4xf32>
    %139 = arith.mulf %135, %22 : vector<8x4xf32>
    %140 = arith.mulf %136, %23 : vector<8x4xf32>
    %141 = arith.subf %139, %140 : vector<8x4xf32>
    %142 = arith.mulf %136, %22 : vector<8x4xf32>
    %143 = arith.mulf %135, %23 : vector<8x4xf32>
    %144 = arith.addf %142, %143 : vector<8x4xf32>
    %145 = tpu.concatenate %141, %144 in 1 : vector<8x4xf32>, vector<8x4xf32> -> vector<8x8xf32>
    %146 = arith.truncf %145 : vector<8x8xf32> to vector<8x8xbf16>
    %147 = arith.mulf %137, %22 : vector<8x4xf32>
    %148 = arith.mulf %138, %23 : vector<8x4xf32>
    %149 = arith.subf %147, %148 : vector<8x4xf32>
    %150 = arith.mulf %138, %22 : vector<8x4xf32>
    %151 = arith.mulf %137, %23 : vector<8x4xf32>
    %152 = arith.addf %150, %151 : vector<8x4xf32>
    %153 = tpu.concatenate %149, %152 in 1 : vector<8x4xf32>, vector<8x4xf32> -> vector<8x8xf32>
    %154 = arith.truncf %153 : vector<8x8xf32> to vector<8x8xbf16>
    %cst_38 = arith.constant dense<0.000000e+00> : vector<8x8xf32>
    %155 = tpu.matmul %146, %154, %cst_38 {dimension_numbers = #tpu.dot_dimension_numbers<[1], [1], [0], [0], [0, 0, 1, 0], [], []>} : vector<8x8xbf16>, vector<8x8xbf16>, vector<8x8xf32> -> vector<8x8xf32>
    %cst_39 = arith.constant dense<0xFF800000> : vector<8xf32>
    %156 = vector.multi_reduction <maximumf>, %155, %cst_39 [1] : vector<8x8xf32> to vector<8xf32>
    %157 = vector.shape_cast %156 : vector<8xf32> to vector<8x1xf32>
    %158 = vector.broadcast %157 : vector<8x1xf32> to vector<8x8xf32>
    %159 = arith.subf %155, %158 : vector<8x8xf32>
    %160 = math.exp %159 : vector<8x8xf32>
    %cst_40 = arith.constant dense<0.000000e+00> : vector<8xf32>
    %161 = vector.multi_reduction <add>, %160, %cst_40 [1] : vector<8x8xf32> to vector<8xf32>
    %162 = vector.shape_cast %161 : vector<8xf32> to vector<8x1xf32>
    %163 = tpu.reciprocal %162 {approx = true} : vector<8x1xf32> -> vector<8x1xf32>
    %164 = vector.broadcast %163 : vector<8x1xf32> to vector<8x8xf32>
    %165 = arith.mulf %160, %164 : vector<8x8xf32>
    %166 = arith.truncf %165 : vector<8x8xf32> to vector<8x8xbf16>
    %cst_41 = arith.constant dense<0.000000e+00> : vector<8x8xf32>
    %167 = tpu.matmul %166, %134, %cst_41 {dimension_numbers = #tpu.dot_dimension_numbers<[1], [0], [0], [1], [0, 0, 1, 1], [], []>} : vector<8x8xbf16>, vector<8x8xbf16>, vector<8x8xf32> -> vector<8x8xf32>
    %168 = tpu.concatenate %59, %95, %131, %167 in 1 : vector<8x8xf32>, vector<8x8xf32>, vector<8x8xf32>, vector<8x8xf32> -> vector<8x32xf32>
    %169 = arith.truncf %168 : vector<8x32xf32> to vector<8x32xbf16>
    %c0_42 = arith.constant 0 : index
    %c0_43 = arith.constant 0 : index
    %170 = vector.load %arg16[%c0_42, %c0_43] : memref<8x32xbf16, #tpu.memory_space<vmem>>, vector<8x32xbf16>
    tpu.vector_store %arg16[%c0_42, %c0_43], %169 {strides = array<i32>} : memref<8x32xbf16, #tpu.memory_space<vmem>>, vector<8x32xbf16>,
    %c0_i32 = arith.constant 0 : i32
    %171 = arith.cmpi eq, %arg1, %c0_i32 : i32
    %172 = arith.extui %171 : i1 to i32
    %c0_i32_44 = arith.constant 0 : i32
    %173 = arith.cmpi ne, %172, %c0_i32_44 : i32
    scf.if %173 {
      %c0_45 = arith.constant 0 : index
      %c0_46 = arith.constant 0 : index
      %174 = vector.load %arg16[%c0_45, %c0_46] : memref<8x32xbf16, #tpu.memory_space<vmem>>, vector<8x32xbf16>
      %c0_47 = arith.constant 0 : index
      %c0_48 = arith.constant 0 : index
      %175 = vector.load %arg11[%c0_47, %c0_48] : memref<32x32xbf16, #tpu.memory_space<vmem>>, vector<32x32xbf16>
      %cst_49 = arith.constant dense<0.000000e+00> : vector<8x32xf32>
      %176 = tpu.matmul %174, %175, %cst_49 {dimension_numbers = #tpu.dot_dimension_numbers<[1], [0], [0], [1], [0, 0, 1, 1], [], []>} : vector<8x32xbf16>, vector<32x32xbf16>, vector<8x32xf32> -> vector<8x32xf32>
      %c0_50 = arith.constant 0 : index
      %c0_51 = arith.constant 0 : index
      %177 = vector.load %arg12[%c0_50, %c0_51] : memref<1x32xf32, #tpu.memory_space<vmem>>, vector<1x32xf32>
      %178 = vector.broadcast %177 : vector<1x32xf32> to vector<8x32xf32>
      %179 = arith.addf %176, %178 : vector<8x32xf32>
      %c0_52 = arith.constant 0 : index
      %c0_53 = arith.constant 0 : index
      %c0_54 = arith.constant 0 : index
      %180 = vector.load %arg15[%c0_52, %c0_53, %c0_54] : memref<1x8x32xf32, #tpu.memory_space<vmem>>, vector<1x8x32xf32>
      %181 = vector.shape_cast %180 : vector<1x8x32xf32> to vector<8x32xf32>
      %182 = vector.shape_cast %179 : vector<8x32xf32> to vector<1x8x32xf32>
      tpu.vector_store %arg15[%c0_52, %c0_53, %c0_54], %182 {strides = array<i32>} : memref<1x8x32xf32, #tpu.memory_space<vmem>>, vector<1x8x32xf32>,
    } else {
    }
    return
  }
  func.func @transform_0(%arg0: i32, %arg1: i32) -> (i32, i32, i32) {
    %c0_i32 = arith.constant 0 : i32
    %c0_i32_0 = arith.constant 0 : i32
    %c0_i32_1 = arith.constant 0 : i32
    return %arg0, %c0_i32, %c0_i32_0 : i32, i32, i32
  }
  func.func @transform_1(%arg0: i32, %arg1: i32) -> (i32, i32, i32) {
    %c0_i32 = arith.constant 0 : i32
    %c0_i32_0 = arith.constant 0 : i32
    %c0_i32_1 = arith.constant 0 : i32
    return %arg0, %c0_i32, %c0_i32_0 : i32, i32, i32
  }
  func.func @transform_2(%arg0: i32, %arg1: i32) -> (i32, i32, i32) {
    %c0_i32 = arith.constant 0 : i32
    %c0_i32_0 = arith.constant 0 : i32
    %c0_i32_1 = arith.constant 0 : i32
    return %arg0, %c0_i32, %c0_i32_0 : i32, i32, i32
  }
  func.func @transform_3(%arg0: i32, %arg1: i32) -> (i32, i32) {
    %c0_i32 = arith.constant 0 : i32
    %c0_i32_0 = arith.constant 0 : i32
    return %c0_i32, %arg1 : i32, i32
  }
  func.func @transform_4(%arg0: i32, %arg1: i32) -> (i32, i32) {
    %c0_i32 = arith.constant 0 : i32
    %c0_i32_0 = arith.constant 0 : i32
    return %c0_i32, %arg1 : i32, i32
  }
  func.func @transform_5(%arg0: i32, %arg1: i32) -> (i32, i32) {
    %c0_i32 = arith.constant 0 : i32
    %c0_i32_0 = arith.constant 0 : i32
    return %c0_i32, %arg1 : i32, i32
  }
  func.func @transform_6(%arg0: i32, %arg1: i32) -> (i32, i32) {
    %c0_i32 = arith.constant 0 : i32
    %c0_i32_0 = arith.constant 0 : i32
    return %c0_i32, %arg1 : i32, i32
  }
  func.func @transform_7(%arg0: i32, %arg1: i32) -> (i32, i32) {
    %c0_i32 = arith.constant 0 : i32
    %c0_i32_0 = arith.constant 0 : i32
    return %c0_i32, %arg1 : i32, i32
  }
  func.func @transform_8(%arg0: i32, %arg1: i32) -> (i32, i32) {
    %c0_i32 = arith.constant 0 : i32
    %c0_i32_0 = arith.constant 0 : i32
    return %c0_i32, %arg1 : i32, i32
  }
  func.func @transform_9(%arg0: i32, %arg1: i32) -> (i32, i32) {
    %c0_i32 = arith.constant 0 : i32
    %c0_i32_0 = arith.constant 0 : i32
    %c0_i32_1 = arith.constant 0 : i32
    return %c0_i32, %c0_i32_0 : i32, i32
  }
  func.func @transform_10(%arg0: i32, %arg1: i32) -> (i32, i32) {
    %c0_i32 = arith.constant 0 : i32
    %c0_i32_0 = arith.constant 0 : i32
    %c0_i32_1 = arith.constant 0 : i32
    return %c0_i32, %c0_i32_0 : i32, i32
  }
  func.func @transform_11(%arg0: i32, %arg1: i32) -> (i32, i32) {
    %c0_i32 = arith.constant 0 : i32
    %c0_i32_0 = arith.constant 0 : i32
    %c0_i32_1 = arith.constant 0 : i32
    return %c0_i32, %c0_i32_0 : i32, i32
  }
  func.func @transform_12(%arg0: i32, %arg1: i32) -> (i32, i32) {
    %c0_i32 = arith.constant 0 : i32
    %c0_i32_0 = arith.constant 0 : i32
    %c0_i32_1 = arith.constant 0 : i32
    return %c0_i32, %c0_i32_0 : i32, i32
  }
  func.func @transform_13(%arg0: i32, %arg1: i32) -> (i32, i32, i32) {
    %c0_i32 = arith.constant 0 : i32
    %c0_i32_0 = arith.constant 0 : i32
    %c0_i32_1 = arith.constant 0 : i32
    return %arg0, %c0_i32, %c0_i32_0 : i32, i32, i32
  }
}

</mosaic_0001>

<bundles_post_ra>
// kernel: tpu_custom_call.1
= control target key start
LH: loop header
LB: loop body
LE: loop exit
PB: predicated region body
PF: predicated region fallthrough
CT: control target
= control target key end

     0   :  { %s3059_s0 = inlined_call_operand.hbm [shape: bf16[2,8,32], index: 0, kind: input, shape index: {}]   ;;  %s3060_s1 = inlined_call_operand.hbm [shape: bf16[2,8,32], index: 1, kind: input, shape index: {}]   ;;  %s3061_s2 = inlined_call_operand.hbm [shape: bf16[2,8,32], index: 2, kind: input, shape index: {}]   ;;  %s3062_s3 = inlined_call_operand.vmem [shape: bf16[32,32], index: 3, kind: input, shape index: {}]   ;;  %s3063_s4 = inlined_call_operand.hbm [shape: f32[1,32], index: 4, kind: input, shape index: {}]   ;;  %s3064_s5 = inlined_call_operand.vmem [shape: bf16[32,32], index: 5, kind: input, shape index: {}]   ;;  %s3065_s6 = inlined_call_operand.hbm [shape: f32[1,32], index: 6, kind: input, shape index: {}]   ;;  %s3066_s7 = inlined_call_operand.hbm [shape: bf16[32,32], index: 7, kind: input, shape index: {}]   ;;  %s3067_s8 = inlined_call_operand.hbm [shape: f32[1,32], index: 8, kind: input, shape index: {}]   ;;  %s3068_s9 = inlined_call_operand.hbm [shape: bf16[32,32], index: 9, kind: input, shape index: {}]   ;;  %s3069_s10 = inlined_call_operand.vmem [shape: f32[1,32], index: 10, kind: input, shape index: {}]   ;;  %s3070_s11 = inlined_call_operand.vmem [shape: f32[8,4], index: 11, kind: input, shape index: {}]   ;;  %s3071_s12 = inlined_call_operand.vmem [shape: f32[8,4], index: 12, kind: input, shape index: {}]   ;;  %s3072_s13 = inlined_call_operand.hbm [shape: f32[2,8,32], index: 13, kind: output, shape index: {}]  }
   0x1   :  { %3090 = sst [smem:[#allocation32_spill]] %s3060_s1 }
   0x2   :  { %3091 = sst [smem:[#allocation33_spill]] %s3063_s4 }
   0x3   :  { %3092 = sst [smem:[#allocation34_spill]] %s3065_s6 }
   0x4   :  { %3093 = sst [smem:[#allocation35_spill]] %s3066_s7 }
   0x5   :  { %3094 = sst [smem:[#allocation36_spill]] %s3069_s10 }
   0x6   :  { %3095 = sst [smem:[#allocation37_spill]] %s3072_s13 }
   0x7   :  { %18 = vsyncpa [#allocation4], 0 }
   0x8   :  { %20 = vsyncpa [#allocation4 + $0x1], 0 }
   0x9   :  { %21 = vsyncpa [#allocation7], 0 }
   0xa   :  { %23 = vsyncpa [#allocation7 + $0x1], 0 }
   0xb   :  { %24 = vsyncpa [#allocation10], 0 }
   0xc   :  { %25 = vsyncpa [#allocation13], 0 }
   0xd   :  { %26 = vsyncpa [#allocation16], 0 }
   0xe   :  { %27 = vsyncpa [#allocation5], 0 }
   0xf   :  { %29 = vsyncpa [#allocation5 + $0x1], 0  ;;  %s2594_s25 = smov 0   ;;  %s2596_s26 = smov 0  }
  0x10   :  { %s2598_s27 = smov 0   ;;  %s2600_s28 = smov 0  }
  0x11   :  { %s2602_s29 = smov 0   ;;  %s2604_s30 = smov 0  }
  0x12 LB: > { %3096 = sst [smem:[#allocation24_spill]] %s2478_s25  ;;  %s2625_s14 = sadd.s32 4294967295, %s2498_s30   ;;  %s2498_s30 = sphi %s2604_s30, %s35_s30   ;;  %s2494_s29 = sphi %s2602_s29, %s3142_s29   ;;  %s2490_s28 = sphi %s2600_s28, %s3141_s28   ;;  %s2486_s27 = sphi %s2598_s27, %s3145_s27   ;;  %s2482_s26 = sphi %s2596_s26, %s3144_s26   ;;  %s2478_s25 = sphi %s2594_s25, %s3143_s25  }
  0x13   : > { %3097 = sst [smem:[#allocation25_spill]] %s2490_s28  ;;  %p1835_p0 = scmp.ge.s32.totalorder %s2498_s30, 1 }
  0x14   : > { %3098 = sst [smem:[#allocation26_spill]] %s2494_s29  ;;  %p3073_p1 = scmp.eq.s32.totalorder %s2625_s14, 0 }
  0x15   : > { %3099 = sst [smem:[#allocation27_spill]] %s2498_s30  ;;  %p396_p2 = scmp.lt.s32.totalorder %s2498_s30, 3 }
  0x16   : > { %s2500_s16 = smov [#allocation9]   ;;  %s2501_s18 = smov [#allocation12]  }
  0x17   : > { %p2630_p3 = pnand %p1835_p0, %p396_p2  ;;  %s418_s17 = sshll.u32 %s2500_s16, 4  ;;  %s419_s17 = int_to_ptr.vmem [resolvable:$true] %s418_s17 }
  0x18   : > { %s450_s19 = sshll.u32 %s2501_s18, 4  ;;  %s2199_s22 = scalar_lea.vmem %s419_s17, 16  ;;  %s451_s19 = int_to_ptr.vmem [resolvable:$true] %s450_s19 }
  0x19   : > { %s3100_s15 = scalar_select %p2630_p3, 1, 0 }
  0x1a   : > { %p2024_p5 = pneg %p2630_p3  ;;  %p2200_p8 = scmp.ne.s32.totalorder %s419_s17, %s2199_s22 }
  0x1b   : > { %s2206_s23 = scalar_lea.vmem %s419_s17, 32  ;;  %p2207_p11 = scmp.lt.s32.totalorder %s419_s17, %s419_s17 }
  0x1c   : > { %p2639_p6 = pnand %p2024_p5, %p3073_p1  ;;  %p2208_p12 = scmp.lt.s32.totalorder %s2206_s23, %s2199_s22 }
  0x1e   : > { %p2645_p7 = pneg %p2639_p6  ;;  %p2209_p13 = por %p2208_p12, %p2207_p11 }
  0x20   : > { %p2202_p9 = pnand %p2200_p8, %p2645_p7 }
  0x22   : > { %p2203_p10 = pneg %p2202_p9 }
  0x24   : > { %p2210_p0 = pnand %p2209_p13, %p2203_p10 }
  0x26   : > { %2213 = shalt.err (!%p2210_p0)
}
  0x27   : > { %s3103_s4 = sld [smem:[#allocation33_spill]]  ;;  %s2225_s18 = scalar_lea.vmem %s451_s19, 256 }
  0x28   : > { %p2226_p2 = scmp.ne.s32.totalorder %s451_s19, %s2225_s18  ;;  %p2233_p8 = scmp.lt.s32.totalorder %s451_s19, %s451_s19 }
  0x29   : > { %p2234_p9 = scmp.lt.s32.totalorder %s2225_s18, %s2225_s18 }
  0x2a   : > { %p2228_p5 = pnand %p2226_p2, %p2645_p7 }
  0x2b   : > { %p2235_p1 = por %p2234_p9, %p2233_p8 }
  0x2c   : > { %p2229_p4 = pneg %p2228_p5 }
  0x2d   : > { %2027 = dma.hbm_to_vmem [thread:$0]  (!%p2639_p6), %s3103_s4, 16, %s419_s17, [#allocation10]  }
  0x2e   : > { %p2236_p3 = pnand %p2235_p1, %p2229_p4 }
  0x30   : > { %2239 = shalt.err (!%p2236_p3)
}
  0x31   : > { %s3076_s22 = smov 64   ;;  %s3077_s17 = smov 4  }
  0x32   : > { %s3104_s7 = sld [smem:[#allocation35_spill]]  ;;  %s1834_s16 = sadd.s32 4294967294, %s2498_s30  }
  0x33   : > { %s47_s18 = sadd.s32 1, %s2494_s29  ;;  %s54_s4 = sadd.s32 1, %s2486_s27 }
  0x34   : > { %p49_p1 = scmp.ge.s32.totalorder %s47_s18, 2  ;;  %p61_p3 = scmp.ne.s32.totalorder %s2486_s27, %s2482_s26 }
  0x35   : > { %p62_p4 = scmp.eq.s32.totalorder %s2498_s30, 0  ;;  %p67_p11 = scmp.ne.s32.totalorder %s2482_s26, %s2478_s25 }
  0x36   : > { %s3147_s18 = smov (%p49_p1, %s47_s18), 0  ;;  %p383_p12 = scmp.eq.s32.totalorder %s2625_s14, 1 }
  0x37   : > { %3105 = sst [smem:[#allocation28_spill]] %s3147_s18  ;;  %p2674_p10 = por %p62_p4, %p61_p3 }
  0x38   : > { %2033 = dma.hbm_to_vmem [thread:$0]  (!%p2639_p6), %s3104_s7, 256, %s451_s19, [#allocation13], %s3076_s22, %s3076_s22, %s3077_s17  }
  0x39   : > { %s51_s19 = ssub.s32 %s2494_s29, %s3147_s18  ;;  %p3107_p0 = scmp.eq.s32.totalorder %s2625_s14, 0 }
  0x3a   : > { %p52_p13 = scmp.eq.s32.totalorder %s51_s19, 0  ;;  %p2689_p5 = por %p383_p12, %p61_p3 }
  0x3b   : > { %p2685_p2 = por %p3107_p0, %p67_p11  ;;  %p389_p8 = scmp.eq.s32.totalorder %s1834_s16, 1 }
  0x3c   : > { %s3109_s24 = scalar_select %p2689_p5, 1, 0 }
  0x3d   : > { %s3108_s23 = scalar_select %p2685_p2, 1, 0 }
  0x3e   : > { %3110 = sst [smem:[#allocation29_spill]] %s3109_s24  ;;  %p2696_p9 = por %p389_p8, %p67_p11 }
  0x3f   : > { %s2694_s22 = scalar_select %p52_p13, %s2486_s27, %s54_s4  }
  0x40   : > { %s3112_s17 = scalar_select %p2696_p9, 1, 0 }
  0x41   : > { %3111 = sst [smem:[#allocation30_spill]] %s2694_s22  ;;  %p2059_p1 = scmp.lt.s32.totalorder %s2498_s30, 2 }
  0x42   : > { %3113 = sst [smem:[#allocation31_spill]] %s3112_s17  ;;  %s3084_s7 = sand.u32 1, %s2486_s27  }
  0x43   : > { %s2703_s18 = sshll.u32 %s2494_s29, 6  ;;  %s2707_s19 = sshll.u32 %s3084_s7, 2 }
  0x44   : > { %p2711_p3 = pnand %p2059_p1, %p2674_p10  ;;  %s517_s4 = sand.u32 1, %s2498_s30  }
  0x45   : > { %s3115_s1 = sld [smem:[#allocation32_spill]]  ;;  %s521_s10 = scalar_lea.vmem [#allocation6], %s2707_s19 }
  0x46   : > { %s528_s29 = sshll.u32 %s521_s10, 4  ;;  %s2721_s24 = scalar_lea.sflag [#allocation7], %s517_s4  ;;  %s529_s29 = int_to_ptr.vmem [resolvable:$true] %s528_s29 }
  0x47   : > { %p3087_p4 = pneg %p2711_p3  ;;  %s2253_s13 = scalar_lea.vmem %s529_s29, 64 }
  0x48   : > { %p2254_p11 = scmp.ne.s32.totalorder %s529_s29, %s2253_s13  ;;  %s2504_s7 = smov [#allocation6]  }
  0x49   : > { %s2258_s28 = sshll.u32 %s2504_s7, 4  ;;  %s2259_s28 = int_to_ptr.vmem [resolvable:$false] %s2258_s28 }
  0x4a   : > { %p2256_p10 = pnand %p2254_p11, %p3087_p4  ;;  %s2260_s30 = scalar_lea.vmem %s2259_s28, 128 }
  0x4b   : > { %s526_s17 = scalar_lea.hbm %s3115_s1, %s2703_s18  ;;  %p2261_p13 = scmp.lt.s32.totalorder %s529_s29, %s2259_s28 }
  0x4c   : > { %p2257_p12 = pneg %p2256_p10  ;;  %p2262_p0 = scmp.lt.s32.totalorder %s2260_s30, %s2253_s13 }
  0x4e   : > { %p2263_p8 = por %p2262_p0, %p2261_p13 }
  0x50   : > { %p2264_p1 = pnand %p2263_p8, %p2257_p12 }
  0x52   : > { %2267 = shalt.err (!%p2264_p1)
}
  0x53   : > { %2046 = dma.hbm_to_vmem [thread:$0]  (!%p2711_p3), %s526_s17, 64, %s529_s29, %s2721_s24  }
  0x54   : > { %s2505_s10 = smov [#allocation11]   ;;  %s2506_s4 = smov [#allocation14]  }
  0x55   : > { %s438_s22 = sshll.u32 %s2505_s10, 4  ;;  %s466_s16 = sshll.u32 %s2506_s4, 4  ;;  %s439_s22 = int_to_ptr.vmem [resolvable:$true] %s438_s22  ;;  %s467_s16 = int_to_ptr.vmem [resolvable:$true] %s466_s16 }
  0x56   : > { %s2279_s1 = scalar_lea.vmem %s439_s22, 16  ;;  %s2286_s7 = scalar_lea.vmem %s439_s22, 32 }
  0x57   : > { %p2280_p11 = scmp.ne.s32.totalorder %s439_s22, %s2279_s1  ;;  %p2287_p9 = scmp.lt.s32.totalorder %s439_s22, %s439_s22 }
  0x58   : > { %p2288_p13 = scmp.lt.s32.totalorder %s2286_s7, %s2279_s1 }
  0x59   : > { %p2282_p10 = pnand %p2280_p11, %p2645_p7 }
  0x5a   : > { %p2289_p12 = por %p2288_p13, %p2287_p9 }
  0x5b   : > { %p2283_p4 = pneg %p2282_p10 }
  0x5d   : > { %p2290_p0 = pnand %p2289_p12, %p2283_p4 }
  0x5f   : > { %2293 = shalt.err (!%p2290_p0)
}
  0x60   : > { %s3116_s6 = sld [smem:[#allocation34_spill]]  ;;  %s2305_s30 = scalar_lea.vmem %s467_s16, 16 }
  0x61   : > { %p2306_p8 = scmp.ne.s32.totalorder %s467_s16, %s2305_s30  ;;  %s2312_s17 = scalar_lea.vmem %s467_s16, 32 }
  0x62   : > { %p2313_p10 = scmp.lt.s32.totalorder %s467_s16, %s467_s16  ;;  %p2314_p5 = scmp.lt.s32.totalorder %s2312_s17, %s2305_s30 }
  0x63   : > { %p2308_p1 = pnand %p2306_p8, %p2645_p7 }
  0x64   : > { %p2315_p2 = por %p2314_p5, %p2313_p10 }
  0x65   : > { %p2309_p11 = pneg %p2308_p1 }
  0x66   : > { %2030 = dma.hbm_to_vmem [thread:$0]  (!%p2639_p6), %s3116_s6, 16, %s439_s22, [#allocation10]  }
  0x67   : > { %p2316_p9 = pnand %p2315_p2, %p2309_p11 }
  0x69   : > { %2319 = shalt.err (!%p2316_p9)
}
  0x6a   : > { %2036 = dma.hbm_to_vmem [thread:$0]  (!%p2639_p6), %s3067_s8, 16, %s467_s16, [#allocation13]  }
  0x6b   : > { %s2507_s10 = smov [#allocation15]  }
  0x6c   : > { %s476_s22 = sshll.u32 %s2507_s10, 4  ;;  %s477_s22 = int_to_ptr.vmem [resolvable:$true] %s476_s22 }
  0x6d   : > { %s2331_s4 = scalar_lea.vmem %s477_s22, 256  ;;  %p2339_p0 = scmp.lt.s32.totalorder %s477_s22, %s477_s22 }
  0x6e   : > { %p2332_p4 = scmp.ne.s32.totalorder %s477_s22, %s2331_s4  ;;  %p2340_p8 = scmp.lt.s32.totalorder %s2331_s4, %s2331_s4 }
  0x70   : > { %p2334_p13 = pnand %p2332_p4, %p2645_p7  ;;  %p2341_p5 = por %p2340_p8, %p2339_p0 }
  0x72   : > { %p2335_p12 = pneg %p2334_p13 }
  0x74   : > { %p2342_p2 = pnand %p2341_p5, %p2335_p12 }
  0x76   : > { %2345 = shalt.err (!%p2342_p2)
}
  0x77   : > { %s3117_s7 = smov 4   ;;  %s3118_s28 = smov 64  }
  0x78   : > { %2039 = dma.hbm_to_vmem [thread:$0]  (!%p2639_p6), %s3068_s9, 256, %s477_s22, [#allocation16], %s3118_s28, %s3118_s28, %s3117_s7  }
  0x79   : > { %s508_s17 = scalar_lea.hbm %s3059_s0, %s2703_s18  ;;  %s503_s1 = scalar_lea.vmem [#allocation3], %s2707_s19 }
  0x7a   : > { %s510_s13 = sshll.u32 %s503_s1, 4  ;;  %s3119_s10 = sand.u32 1, %s2486_s27   ;;  %s511_s13 = int_to_ptr.vmem [resolvable:$true] %s510_s13 }
  0x7b   : > { %s500_s20 = scalar_lea.sflag [#allocation4], %s3119_s10  ;;  %s2359_s4 = scalar_lea.vmem %s511_s13, 64 }
  0x7c   : > { %p2360_p7 = scmp.ne.s32.totalorder %s511_s13, %s2359_s4  ;;  %p3120_p1 = pneg %p2711_p3 }
  0x7d   : > { %s2508_s29 = smov [#allocation3]  }
  0x7e   : > { %p2362_p11 = pnand %p2360_p7, %p3120_p1  ;;  %s2364_s16 = sshll.u32 %s2508_s29, 4  ;;  %s2365_s16 = int_to_ptr.vmem [resolvable:$false] %s2364_s16 }
  0x7f   : > { %s2366_s6 = scalar_lea.vmem %s2365_s16, 128  ;;  %p2367_p6 = scmp.lt.s32.totalorder %s511_s13, %s2365_s16 }
  0x80   : > { %p2363_p10 = pneg %p2362_p11  ;;  %p2368_p9 = scmp.lt.s32.totalorder %s2366_s6, %s2359_s4 }
  0x82   : > { %p2369_p4 = por %p2368_p9, %p2367_p6 }
  0x84   : > { %p2370_p13 = pnand %p2369_p4, %p2363_p10 }
  0x86   : > { %2373 = shalt.err (!%p2370_p13)
}
  0x87   : > { %2043 = dma.hbm_to_vmem [thread:$0]  (!%p2711_p3), %s508_s17, 64, %s511_s13, %s500_s20  }
  0x88   : > { %s544_s28 = scalar_lea.hbm %s3061_s2, %s2703_s18  ;;  %s539_s21 = scalar_lea.vmem [#allocation8], %s2707_s19 }
  0x89   : > { %s546_s30 = sshll.u32 %s539_s21, 4  ;;  %p3121_p0 = pmov %p3120_p1  ;;  %s547_s30 = int_to_ptr.vmem [resolvable:$true] %s546_s30 }
  0x8a   : > { %s2387_s1 = scalar_lea.vmem %s547_s30, 64  ;;  %s2509_s6 = smov [#allocation8]  }
  0x8b   : > { %p2388_p12 = scmp.ne.s32.totalorder %s547_s30, %s2387_s1  ;;  %s2392_s10 = sshll.u32 %s2509_s6, 4  ;;  %s2393_s10 = int_to_ptr.vmem [resolvable:$false] %s2392_s10 }
  0x8c   : > { %s2394_s4 = scalar_lea.vmem %s2393_s10, 128  ;;  %p2395_p2 = scmp.lt.s32.totalorder %s547_s30, %s2393_s10 }
  0x8d   : > { %p2390_p8 = pnand %p2388_p12, %p3121_p0  ;;  %p2396_p7 = scmp.lt.s32.totalorder %s2394_s4, %s2387_s1 }
  0x8f   : > { %p2391_p5 = pneg %p2390_p8  ;;  %p2397_p1 = por %p2396_p7, %p2395_p2 }
  0x91   : > { %p2398_p11 = pnand %p2397_p1, %p2391_p5 }
  0x93   : > { %2401 = shalt.err (!%p2398_p11)
}
  0x94   : > { %2049 = dma.hbm_to_vmem [thread:$0]  (!%p2711_p3), %s544_s28, 64, %s547_s30, %s2721_s24  }
  0x95   : > { %p3122_p10 = scmp.ne.s32.totalorder %s3100_s15, 0 }
  0x96   : > { %s2781_s18 = sand.u32 (!%p3122_p10), 1, %s2482_s26   ;;  %p3123_p6 = scmp.ne.s32.totalorder (!%p3122_p10), %s3108_s23, 0 }
  0x97   : > { %555 = sbr.rel (%p3122_p10) target bundleno = 1674 (0x68a), region = 72  ;;  %s2784_s19 = sshll.u32 (!%p3122_p10), %s2781_s18, 2 }
  0x98   : > { %s558_s17 = scalar_lea.sflag (!%p3122_p10), [#allocation4], %s2781_s18  ;;  %s561_s13 = scalar_lea.vmem (!%p3122_p10), [#allocation3], %s2784_s19 }
  0x9c   : > { %2453 = dma.done.wait (%p3123_p6), %s558_s17, 64  }
  0x9d   : > { %2455 = vsyncadd (%p3123_p6), %s558_s17, 4294967232  ;;  %s566_s25 = sand.u32 1, %s2625_s14   ;;  %s570_s24 = scalar_lea.vmem [#allocation6], %s2784_s19 }
  0x9e   : > { %s567_s15 = scalar_lea.sflag [#allocation7], %s566_s25 }
  0x9f   : > { %2457 = dma.done.wait (%p3123_p6), %s567_s15, 128  }
  0xa0   : > { %2459 = vsyncadd (%p3123_p6), %s567_s15, 4294967168  ;;  %s579_s20 = scalar_lea.vmem [#allocation8], %s2784_s19  ;;  %p3124_p3 = scmp.eq.s32.totalorder %s2625_s14, 0 }
  0xa2   : > { %2461 = dma.done.wait (%p3124_p3), [#allocation10], 32   ;;  %p3125_p9 = pmov %p3124_p3 }
  0xa3   : > { %p3126_p4 = pmov %p3124_p3 }
  0xa4   : > { %2463 = vsyncadd (%p3125_p9), [#allocation10], 4294967264 }
  0xa5   : > { %2465 = dma.done.wait (%p3126_p4), [#allocation13], 272   ;;  %p3127_p13 = pmov %p3124_p3 }
  0xa6   : > { %p3128_p12 = pmov %p3124_p3 }
  0xa7   : > { %2467 = vsyncadd (%p3127_p13), [#allocation13], 4294967024 }
  0xa8   : > { %2469 = dma.done.wait (%p3128_p12), [#allocation16], 256   ;;  %p3129_p0 = pmov %p3124_p3 }
  0xa9   : > { %v2510_v0 = vmov 0.0   ;;  %vm2511_vm0 = vmmov 0   ;;  %v2164_v1 = vld [vmem:[%s3062_s3 + $0x8] sm:$0xff]   ;;  %v2166_v3 = vld [vmem:[%s3062_s3] sm:$0xff]   ;;  %vm695_vm1 = vcmask 261120   ;;  %s2512_s6 = smov 12  }
  0xaa   : > { %2471 = vsyncadd (%p3129_p0), [#allocation16], 4294967040  ;;  %1916 = vmatprep.subr.bf16.mxu0 %v2510_v0  ;;  %1924 = vmatprep.subr.bf16.mxu1 %v2510_v0  ;;  %v2165_v2 = vld [vmem:[%s3064_s5 + $0x8] sm:$0xff]   ;;  %v2167_v4 = vld [vmem:[%s3064_s5] sm:$0xff]   ;;  %s2513_s10 = smov 20   ;;  %s2514_s4 = smov 8  }
  0xab   : > { %1920 = vmatprep.mubr.msk.bf16.mxu0 %vm2511_vm0, %v2510_v0  ;;  %1928 = vmatprep.mubr.msk.bf16.mxu1 %vm2511_vm0, %v2510_v0  ;;  %v669_v5 = vld [vmem:[%s561_s13] sm:$0xf]  ;;  %v670_v7 = vld [vmem:[%s570_s24] sm:$0xf]  ;;  %s2515_s17 = smov 16   ;;  %s2516_s13 = smov 28  }
  0xac   : > { %1917 = vmatpush3.bf16.msra.mxu0 %v2164_v1  ;;  %1925 = vmatpush3.bf16.msra.mxu1 %v2165_v2  ;;  %v2834_v6 = vld [vmem:[%s3071_s12] sm:$0xff]  ;;  %s2517_s25 = smov 24   ;;  %s2518_s23 = smov 4   ;;  %v1864_v10 = vld [vmem:[#allocation11] ss:$0 sm:$0xff]  ;;  %vm896_vm2 = vcmask 31744  }
  0xad   : > { %1918 = vmatprep.subr.bf16.mxu0 %v2510_v0  ;;  %1926 = vmatprep.subr.bf16.mxu1 %v2510_v0  ;;  %v2856_v8 = vld [vmem:[%s3070_s11] sm:$0xff]  ;;  %v1860_v12 = vld [vmem:[#allocation9] ss:$0 sm:$0xff]  ;;  %s2519_s29 = smov 124   ;;  %s2520_s16 = smov 120   ;;  %vm915_vm3 = vcmask 64512  }
  0xae   : > { %1025 = vrot.lane.b32.xlu0 %v2834_v6, %s2512_s6  ;;  %1192 = vrot.lane.b32.xlu1 %v2834_v6, %s2513_s10  ;;  %s2521_s22 = smov 112   ;;  %s2522_s14 = smov 104   ;;  %vm977_vm4 = vcmask 1043456   ;;  %vm1533_vm5 = vcmask 130048   ;;  %vm1535_vm6 = vcmask 195584   ;;  %vm1538_vm7 = vcmask 257024  }
  0xaf   : > { %s3130_s19 = sld [smem:[#allocation25_spill]]  ;;  %s1859_s7 = sshll.u32 %s2781_s18, 3 }
  0xb0   : > { %1919 = vmatpush3.bf16.msra.mxu0 %v2166_v3  ;;  %1927 = vmatpush3.bf16.msra.mxu1 %v2167_v4  ;;  %s3132_s30 = sld [smem:[#allocation36_spill]]  ;;  %s1613_s15 = scalar_lea.sflag [#allocation5], %s2781_s18 }
  0xb1   : > { %1932 = vmatprep.subr.bf16.mxu0 %v2510_v0  ;;  %1940 = vmatprep.subr.bf16.mxu1 %v2510_v0 }
  0xb2   : > { %1038 = vrot.lane.b32.xlu0 %v2834_v6, %s2514_s4  ;;  %1205 = vrot.lane.b32.xlu1 %v2834_v6, %s2515_s17 }
  0xb3   : > { %1921 = vmatmul.mubr.msk.bf16.vlgmr.msra.gmra.mxu0 %vm695_vm1, %v669_v5  ;;  %1929 = vmatmul.mubr.msk.bf16.vlgmr.msra.gmra.mxu1 %vm695_vm1, %v670_v7 }
  0xb4   : > { %1942 = vmatprep.mubr.msk.bf16.mxu1 %vm2511_vm0, %v2510_v0  ;;  %1936 = vmatprep.mubr.msk.bf16.mxu0 %vm2511_vm0, %v2510_v0 }
  0xb5   : > { %s1885_s1 = sshll.u32 %s3130_s19, 7 }
  0xb6   : > { %1358 = vrot.lane.b32.xlu0 %v2834_v6, %s2516_s13  ;;  %1371 = vrot.lane.b32.xlu1 %v2834_v6, %s2517_s25 }
  0xba   : > { %876 = vrot.lane.b32.xlu0 %v2834_v6, %s2518_s23  ;;  %1021 = vrot.lane.b32.xlu1 %v2856_v8, %s2514_s4 }
  0xbe   : > { %1034 = vrot.lane.b32.xlu0 %v2856_v8, %s2512_s6  ;;  %1188 = vrot.lane.b32.xlu1 %v2856_v8, %s2515_s17  ;;  %s659_s6 = scalar_lea.vmem [#allocation17], %s1859_s7 }
  0xc2   : > { %1201 = vrot.lane.b32.xlu0 %v2856_v8, %s2513_s10  ;;  %1354 = vrot.lane.b32.xlu1 %v2856_v8, %s2517_s25  ;;  %s1626_s10 = sshll.u32 %s659_s6, 4  ;;  %s3012_s10 = int_to_ptr.vmem [resolvable:$true] %s1626_s10 }
  0xc3   : > { %s2402_s24 = scalar_lea.vmem %s3012_s10, 128 }
  0xc4   : > { %p2403_p8 = scmp.ne.s32.totalorder %s3012_s10, %s2402_s24 }
  0xc6   : > { %1367 = vrot.lane.b32.xlu0 %v2856_v8, %s2516_s13  ;;  %s3133_s13 = sld [smem:[#allocation37_spill]] }
 0x120   : > { %v1026_v9 = vpop.permute.xlu0 %1025  ;;  %v1193_v22 = vpop.permute.xlu1 %1192 }
 0x124   : > { %v1039_v16 = vpop.permute.xlu0 %1038  ;;  %v1206_v28 = vpop.permute.xlu1 %1205 }
 0x128   : > { %v1359_v33 = vpop.permute.xlu0 %1358  ;;  %v1372_v34 = vpop.permute.xlu1 %1371 }
 0x12c   : > { %v877_v39 = vpop.permute.xlu0 %876  ;;  %v1022_v45 = vpop.permute.xlu1 %1021 }
 0x130   : > { %v1035_v44 = vpop.permute.xlu0 %1034  ;;  %v1189_v47 = vpop.permute.xlu1 %1188 }
 0x134   : > { %v1202_v46 = vpop.permute.xlu0 %1201  ;;  %v1355_v49 = vpop.permute.xlu1 %1354 }
 0x138   : > { %v1368_v48 = vpop.permute.xlu0 %1367 }
 0x173   : > { %v733_v11 = vpop.f32.mrf.mxu0  ;;  %v799_v13 = vpop.f32.mrf.mxu1 }
 0x174   : > { %v2869_v14 = vadd.f32 %v1864_v10, %v799_v13  ;;  %v2871_v18 = vadd.f32 %v1860_v12, %v733_v11 }
 0x175   : > { %v1922_v15 = vpop.f32.mrf.mxu0  ;;  %v1930_v17 = vpop.f32.mrf.mxu1 }
 0x176   : > { %v1065_v20 = vmul.f32 %v1039_v16, %v2869_v14  ;;  %v1058_v21 = vmul.f32 %v1026_v9, %v2869_v14  ;;  %v1041_v26 = vmul.f32 %v1039_v16, %v2871_v18  ;;  %v1028_v27 = vmul.f32 %v1026_v9, %v2871_v18 }
 0x177   : > { %v736_v19 = vpop.f32.mrf.mxu0  ;;  %v802_v23 = vpop.f32.mrf.mxu1  ;;  %v1232_v29 = vmul.f32 %v1206_v28, %v2869_v14  ;;  %v1225_v30 = vmul.f32 %v1193_v22, %v2869_v14  ;;  %v1208_v31 = vmul.f32 %v1206_v28, %v2871_v18  ;;  %v1195_v32 = vmul.f32 %v1193_v22, %v2871_v18 }
 0x178   : > { %1067 = vrot.lane.b32.xlu0 %v1065_v20, %s2518_s23  ;;  %1060 = vrot.lane.b32.xlu1 %v1058_v21, %s2519_s29  ;;  %v1398_v35 = vmul.f32 %v1372_v34, %v2869_v14  ;;  %v1391_v36 = vmul.f32 %v1359_v33, %v2869_v14  ;;  %v1374_v37 = vmul.f32 %v1372_v34, %v2871_v18 }
 0x179   : > { %v1923_v24 = vpop.f32.mrf.mxu0  ;;  %v1931_v25 = vpop.f32.mrf.mxu1  ;;  %v1361_v38 = vmul.f32 %v1359_v33, %v2871_v18  ;;  %v900_v40 = vmul.f32 %v877_v39, %v2869_v14  ;;  %v907_v41 = vmul.f32 %v2834_v6, %v2869_v14  ;;  %v879_v42 = vmul.f32 %v877_v39, %v2871_v18 }
 0x17a   : > { %v890_v43 = vmul.f32 %v2834_v6, %v2871_v18  ;;  %v1064_v50 = vmul.f32 %v1035_v44, %v2869_v14  ;;  %v1057_v51 = vmul.f32 %v1022_v45, %v2869_v14  ;;  %v1037_v57 = vmul.f32 %v1035_v44, %v2871_v18 }
 0x17b   : > { %v1024_v58 = vmul.f32 %v1022_v45, %v2871_v18  ;;  %v1231_v1 = vmul.f32 %v1202_v46, %v2869_v14  ;;  %v1224_v2 = vmul.f32 %v1189_v47, %v2869_v14  ;;  %v1204_v9 = vmul.f32 %v1202_v46, %v2871_v18 }
 0x17c   : > { %1043 = vrot.lane.b32.xlu0 %v1041_v26, %s2518_s23  ;;  %1030 = vrot.lane.b32.xlu1 %v1028_v27, %s2519_s29  ;;  %v1191_v10 = vmul.f32 %v1189_v47, %v2871_v18  ;;  %v1397_v16 = vmul.f32 %v1368_v48, %v2869_v14  ;;  %v1390_v17 = vmul.f32 %v1355_v49, %v2869_v14 }
 0x17d   : > { %v1370_v24 = vmul.f32 %v1368_v48, %v2871_v18  ;;  %v1357_v25 = vmul.f32 %v1355_v49, %v2871_v18  ;;  %v899_v34 = vmul.f32 %v2856_v8, %v2869_v14  ;;  %v874_v44 = vmul.f32 %v2856_v8, %v2871_v18  ;;  %v2168_v49 = vld [vmem:[#allocation12 + $0x8] sm:$0xff]  }
 0x17e   : > { %1933 = vmatpush3.bf16.msra.mxu0 %v2168_v49 }
 0x17f   : > { %1934 = vmatprep.subr.bf16.mxu0 %v2510_v0 }
 0x180   : > { %1234 = vrot.lane.b32.xlu0 %v1232_v29, %s2518_s23  ;;  %1227 = vrot.lane.b32.xlu1 %v1225_v30, %s2519_s29 }
 0x184   : > { %1210 = vrot.lane.b32.xlu0 %v1208_v31, %s2518_s23  ;;  %1197 = vrot.lane.b32.xlu1 %v1195_v32, %s2519_s29 }
 0x188   : > { %1400 = vrot.lane.b32.xlu0 %v1398_v35, %s2518_s23  ;;  %1393 = vrot.lane.b32.xlu1 %v1391_v36, %s2519_s29 }
 0x18c   : > { %1376 = vrot.lane.b32.xlu0 %v1374_v37, %s2518_s23  ;;  %1363 = vrot.lane.b32.xlu1 %v1361_v38, %s2519_s29 }
 0x190   : > { %902 = vrot.lane.b32.xlu0 %v900_v40, %s2519_s29  ;;  %886 = vrot.lane.b32.xlu1 %v2856_v8, %s2518_s23  ;;  %v671_v8 = vld [vmem:[%s579_s20] sm:$0xf]  ;;  %s3131_s20 = sld [smem:[#allocation29_spill]] }
 0x194   : > { %909 = vrot.lane.b32.xlu1 %v907_v41, %s2518_s23  ;;  %881 = vrot.lane.b32.xlu0 %v879_v42, %s2519_s29 }
 0x196   : > { %p3134_p5 = scmp.ne.s32.totalorder %s3131_s20, 0 }
 0x198   : > { %892 = vrot.lane.b32.xlu1 %v890_v43, %s2518_s23  ;;  %p2404_p2 = pnand %p2403_p8, %p3134_p5  ;;  %s2523_s23 = smov [#allocation17]  }
 0x199   : > { %s2406_s29 = sshll.u32 %s2523_s23, 4  ;;  %s2407_s29 = int_to_ptr.vmem [resolvable:$false] %s2406_s29 }
 0x19a   : > { %p2405_p7 = pneg %p2404_p2  ;;  %p2409_p1 = scmp.lt.s32.totalorder %s3012_s10, %s2407_s29 }
 0x1ea   : > { %v1068_v52 = vpop.permute.xlu0 %1067  ;;  %v1061_v53 = vpop.permute.xlu1 %1060 }
 0x1eb   : > { %v1070_v54 = vadd.f32 %v1068_v52, %v1064_v50  ;;  %v1063_v55 = vsub.f32 %v1057_v51, %v1061_v53  ;;  %v2169_v50 = vld [vmem:[#allocation12] sm:$0xff]  }
 0x1ec   : > { %1935 = vmatpush3.bf16.msra.mxu0 %v2169_v50 }
 0x1ed   : > { %v2134_v56 = vpack.i.bf16 %v1070_v54, %v1063_v55  ;;  %1946 = vmatprep.subr.bf16.mxu0 %v2510_v0 }
 0x1ee   : > { %v1044_v59 = vpop.permute.xlu0 %1043  ;;  %v1031_v60 = vpop.permute.xlu1 %1030 }
 0x1ef   : > { %v1046_v61 = vadd.f32 %v1044_v59, %v1037_v57  ;;  %v1033_v62 = vsub.f32 %v1024_v58, %v1031_v60  ;;  %2135 = vrot.lane.b32.xlu0 %v2134_v56, %s2520_s16  ;;  %1937 = vmatmul.mubr.msk.bf16.vlgmr.msra.gmra.mxu0 %vm695_vm1, %v671_v8 }
 0x1f0   : > { %1948 = vmatprep.mubr.msk.bf16.mxu0 %vm2511_vm0, %v2510_v0 }
 0x1f1   : > { %v2139_v63 = vpack.i.bf16 %v1046_v61, %v1033_v62 }
 0x1f2   : > { %v1235_v3 = vpop.permute.xlu0 %1234  ;;  %v1228_v4 = vpop.permute.xlu1 %1227 }
 0x1f3   : > { %v1237_v5 = vadd.f32 %v1235_v3, %v1231_v1  ;;  %v1230_v6 = vsub.f32 %v1224_v2, %v1228_v4  ;;  %2140 = vrot.lane.b32.xlu1 %v2139_v63, %s2520_s16 }
 0x1f5   : > { %v2144_v7 = vpack.i.bf16 %v1237_v5, %v1230_v6 }
 0x1f6   : > { %v1211_v11 = vpop.permute.xlu0 %1210  ;;  %v1198_v12 = vpop.permute.xlu1 %1197 }
 0x1f7   : > { %v1213_v13 = vadd.f32 %v1211_v11, %v1204_v9  ;;  %v1200_v15 = vsub.f32 %v1191_v10, %v1198_v12  ;;  %2145 = vrot.lane.b32.xlu0 %v2144_v7, %s2521_s22 }
 0x1f9   : > { %v2149_v19 = vpack.i.bf16 %v1213_v13, %v1200_v15 }
 0x1fa   : > { %v1401_v20 = vpop.permute.xlu0 %1400  ;;  %v1394_v21 = vpop.permute.xlu1 %1393 }
 0x1fb   : > { %v1403_v22 = vadd.f32 %v1401_v20, %v1397_v16  ;;  %v1396_v23 = vsub.f32 %v1390_v17, %v1394_v21  ;;  %2150 = vrot.lane.b32.xlu1 %v2149_v19, %s2521_s22 }
 0x1fd   : > { %v2154_v26 = vpack.i.bf16 %v1403_v22, %v1396_v23 }
 0x1fe   : > { %v1377_v27 = vpop.permute.xlu0 %1376  ;;  %v1364_v28 = vpop.permute.xlu1 %1363 }
 0x1ff   : > { %v1379_v29 = vadd.f32 %v1377_v27, %v1370_v24  ;;  %v1366_v30 = vsub.f32 %v1357_v25, %v1364_v28  ;;  %2155 = vrot.lane.b32.xlu0 %v2154_v26, %s2522_s14  ;;  %v1868_v28 = vld [vmem:[#allocation14] ss:$0 sm:$0xff] }
 0x201   : > { %v2159_v31 = vpack.i.bf16 %v1379_v29, %v1366_v30 }
 0x202   : > { %v887_v32 = vpop.permute.xlu1 %886  ;;  %v903_v33 = vpop.permute.xlu0 %902 }
 0x203   : > { %2160 = vrot.lane.b32.xlu1 %v2159_v31, %s2522_s14  ;;  %v906_v35 = vmul.f32 %v887_v32, %v2869_v14  ;;  %v905_v37 = vsub.f32 %v899_v34, %v903_v33  ;;  %v889_v39 = vmul.f32 %v887_v32, %v2871_v18 }
 0x206   : > { %v910_v36 = vpop.permute.xlu1 %909  ;;  %v882_v42 = vpop.permute.xlu0 %881 }
 0x207   : > { %v912_v38 = vadd.f32 %v910_v36, %v906_v35  ;;  %v884_v14 = vsub.f32 %v874_v44, %v882_v42 }
 0x209   : > { %v913_v40 = vsel %vm896_vm2, %v905_v37, %v912_v38 }
 0x20a   : > { %v914_v41 = vpack.c.bf16 %v913_v40, %v913_v40  ;;  %v893_v43 = vpop.permute.xlu1 %892 }
 0x20b   : > { %v895_v45 = vadd.f32 %v893_v43, %v889_v39 }
 0x20c   : > { %v920_v46 = vsel %vm915_vm3, %v914_v41, 0 }
 0x20d   : > { %1941 = vmatpush3.bf16.xpose.msra.mxu1 %v920_v46  ;;  %v897_v47 = vsel %vm896_vm2, %v884_v14, %v895_v45 }
 0x20e   : > { %1952 = vmatprep.subr.bf16.mxu1 %v2510_v0  ;;  %v898_v48 = vpack.c.bf16 %v897_v47, %v897_v47 }
 0x214   : > { %1943 = vmatmul.mubr.msk.bf16.vlgmr.msra.gmra.mxu1 %vm915_vm3, %v898_v48 }
 0x215   : > { %1954 = vmatprep.mubr.msk.bf16.mxu1 %vm2511_vm0, %v2510_v0 }
 0x261   : > { %v2136_v18 = vpop.permute.xlu0 %2135 }
 0x262   : > { %v2138_v51 = vunpack.i.h.bf16 %v2136_v18  ;;  %v2137_v52 = vunpack.i.l.bf16 %v2136_v18 }
 0x264   : > { %v1079_v53 = vsel %vm896_vm2, %v2137_v52, %v2138_v51 }
 0x265   : > { %v2141_v54 = vpop.permute.xlu1 %2140  ;;  %v1080_v55 = vpack.c.bf16 %v1079_v53, %v1079_v53 }
 0x266   : > { %v2143_v56 = vunpack.i.h.bf16 %v2141_v54  ;;  %v2142_v57 = vunpack.i.l.bf16 %v2141_v54 }
 0x267   : > { %v1085_v58 = vsel %vm915_vm3, %v1080_v55, 0 }
 0x268   : > { %1953 = vmatpush3.bf16.xpose.msra.mxu1 %v1085_v58  ;;  %v1055_v60 = vsel %vm896_vm2, %v2142_v57, %v2143_v56 }
 0x269   : > { %v2146_v59 = vpop.permute.xlu0 %2145  ;;  %1964 = vmatprep.subr.bf16.mxu1 %v2510_v0  ;;  %v1056_v1 = vpack.c.bf16 %v1055_v60, %v1055_v60 }
 0x26a   : > { %v2148_v61 = vunpack.i.h.bf16 %v2146_v59  ;;  %v2147_v62 = vunpack.i.l.bf16 %v2146_v59 }
 0x26c   : > { %v1246_v63 = vsel %vm896_vm2, %v2147_v62, %v2148_v61 }
 0x26d   : > { %v2151_v2 = vpop.permute.xlu1 %2150  ;;  %v1247_v3 = vpack.c.bf16 %v1246_v63, %v1246_v63 }
 0x26e   : > { %v2153_v4 = vunpack.i.h.bf16 %v2151_v2  ;;  %v2152_v5 = vunpack.i.l.bf16 %v2151_v2 }
 0x26f   : > { %1955 = vmatmul.mubr.msk.bf16.vlgmr.msra.gmra.mxu1 %vm915_vm3, %v1056_v1  ;;  %v1252_v6 = vsel %vm915_vm3, %v1247_v3, 0 }
 0x270   : > { %1965 = vmatpush3.bf16.xpose.msra.mxu1 %v1252_v6  ;;  %1966 = vmatprep.mubr.msk.bf16.mxu1 %vm2511_vm0, %v2510_v0  ;;  %v1222_v9 = vsel %vm896_vm2, %v2152_v5, %v2153_v4 }
 0x271   : > { %v2156_v7 = vpop.permute.xlu0 %2155  ;;  %1976 = vmatprep.subr.bf16.mxu1 %v2510_v0  ;;  %v1223_v13 = vpack.c.bf16 %v1222_v9, %v1222_v9 }
 0x272   : > { %v2158_v10 = vunpack.i.h.bf16 %v2156_v7  ;;  %v2157_v11 = vunpack.i.l.bf16 %v2156_v7 }
 0x274   : > { %v1412_v12 = vsel %vm896_vm2, %v2157_v11, %v2158_v10 }
 0x275   : > { %v2161_v15 = vpop.permute.xlu1 %2160  ;;  %v1413_v16 = vpack.c.bf16 %v1412_v12, %v1412_v12 }
 0x276   : > { %v2163_v17 = vunpack.i.h.bf16 %v2161_v15  ;;  %v2162_v19 = vunpack.i.l.bf16 %v2161_v15 }
 0x277   : > { %1967 = vmatmul.mubr.msk.bf16.vlgmr.msra.gmra.mxu1 %vm915_vm3, %v1223_v13  ;;  %v1418_v20 = vsel %vm915_vm3, %v1413_v16, 0 }
 0x278   : > { %1977 = vmatpush3.bf16.xpose.msra.mxu1 %v1418_v20  ;;  %1978 = vmatprep.mubr.msk.bf16.mxu1 %vm2511_vm0, %v2510_v0  ;;  %v1388_v21 = vsel %vm896_vm2, %v2162_v19, %v2163_v17 }
 0x279   : > { %1988 = vmatprep.subr.bf16.mxu1 %v2510_v0  ;;  %v1389_v22 = vpack.c.bf16 %v1388_v21, %v1388_v21 }
 0x27f   : > { %1979 = vmatmul.mubr.msk.bf16.vlgmr.msra.gmra.mxu1 %vm915_vm3, %v1389_v22 }
 0x280   : > { %1992 = vmatprep.mubr.msk.bf16.mxu1 %vm2511_vm0, %v2510_v0 }
 0x2af   : > { %v865_v29 = vpop.f32.mrf.mxu0 }
 0x2b0   : > { %v866_v30 = vadd.f32 %v1868_v28, %v865_v29 }
 0x2b1   : > { %v1938_v31 = vpop.f32.mrf.mxu0 }
 0x2b2   : > { %v871_v32 = vpack.c.bf16 %v866_v30, %v866_v30 }
 0x2b3   : > { %v868_v33 = vpop.f32.mrf.mxu0 }
 0x2b4   : > { %v979_v34 = vsel %vm977_vm4, %v871_v32, 0 }
 0x2b5   : > { %v1939_v35 = vpop.f32.mrf.mxu0  ;;  %1947 = vmatpush3.bf16.msra.mxu0 %v979_v34 }
 0x2b6   : > { %1958 = vmatprep.subr.bf16.mxu0 %v2510_v0 }
 0x2d4   : > { %v956_v23 = vpop.f32.mrf.mxu1 }
 0x2d5   : > { %v962_v24 = vsel %vm915_vm3, %v956_v23, -inf }
 0x2d6   : > { %963 = vmax.xlane.f32.xlu0 %v962_v24  ;;  %v1944_v25 = vpop.f32.mrf.mxu1 }
 0x2d8   : > { %v959_v26 = vpop.f32.mrf.mxu1 }
 0x2da   : > { %v1945_v27 = vpop.f32.mrf.mxu1 }
 0x32f   : > { %v1121_v36 = vpop.f32.mrf.mxu1 }
 0x330   : > { %v1127_v37 = vsel %vm915_vm3, %v1121_v36, -inf }
 0x331   : > { %1128 = vmax.xlane.f32.xlu1 %v1127_v37  ;;  %v1956_v38 = vpop.f32.mrf.mxu1 }
 0x332   : > { %v2170_v38 = vld [vmem:[#allocation15 + $0x8] sm:$0xff]  }
 0x333   : > { %v1124_v39 = vpop.f32.mrf.mxu1  ;;  %1989 = vmatpush3.bf16.msra.mxu1 %v2170_v38 }
 0x334   : > { %1990 = vmatprep.subr.bf16.mxu1 %v2510_v0 }
 0x335   : > { %v1957_v40 = vpop.f32.mrf.mxu1 }
 0x336   : > { %v2171_v40 = vld [vmem:[#allocation15] sm:$0xff]  }
 0x337   : > { %v1288_v41 = vpop.f32.mrf.mxu1  ;;  %1991 = vmatpush3.bf16.msra.mxu1 %v2171_v40 }
 0x338   : > { %v1294_v42 = vsel %vm915_vm3, %v1288_v41, -inf }
 0x339   : > { %1295 = vmax.xlane.f32.xlu0 %v1294_v42  ;;  %v1968_v43 = vpop.f32.mrf.mxu1 }
 0x33b   : > { %v1291_v44 = vpop.f32.mrf.mxu1 }
 0x33d   : > { %v1969_v45 = vpop.f32.mrf.mxu1 }
 0x33f   : > { %v1454_v46 = vpop.f32.mrf.mxu1 }
 0x340   : > { %v1460_v14 = vsel %vm915_vm3, %v1454_v46, -inf }
 0x341   : > { %1461 = vmax.xlane.f32.xlu0 %v1460_v14  ;;  %v1980_v47 = vpop.f32.mrf.mxu1 }
 0x343   : > { %v1457_v48 = vpop.f32.mrf.mxu1 }
 0x345   : > { %v1981_v49 = vpop.f32.mrf.mxu1 }
 0x35f   : > { %v964_v50 = vpop.xlane.xlu0 %963 }
 0x360   : > { %v965_v8 = vsub.f32 %v956_v23, %v964_v50 }
 0x362   : > { %v966_v18 = vmul.f32 1.442695, %v965_v8 }
 0x364   : > { %2172 = vpow2.f32 %v966_v18 }
 0x371   : > { %v2173_v51 = vpop.eup %2172 }
 0x372   : > { %v968_v52 = vsel %vm915_vm3, %v2173_v51, 0.0 }
 0x373   : > { %969 = vadd.xlane.f32.xlu1 %v968_v52  ;;  %v1880_v52 = vld [vmem:[%s3132_s30] ss:$0 sm:$0xff] }
 0x384   : > { %1140 = vrot.lane.b32.xlu1 %v871_v32, %s2520_s16  ;;  %s2408_s16 = scalar_lea.vmem %s2407_s29, 256 }
 0x385   : > { %p2410_p11 = scmp.lt.s32.totalorder %s2408_s16, %s2402_s24 }
 0x387   : > { %p2411_p10 = por %p2410_p11, %p2409_p1 }
 0x389   : > { %p2412_p6 = pnand %p2411_p10, %p2405_p7 }
 0x3ba   : > { %v1129_v53 = vpop.xlane.xlu1 %1128 }
 0x3bb   : > { %v1130_v54 = vsub.f32 %v1121_v36, %v1129_v53 }
 0x3bd   : > { %v1131_v55 = vmul.f32 1.442695, %v1130_v54 }
 0x3bf   : > { %2174 = vpow2.f32 %v1131_v55 }
 0x3c2   : > { %v1296_v56 = vpop.xlane.xlu0 %1295 }
 0x3c3   : > { %v1297_v57 = vsub.f32 %v1288_v41, %v1296_v56 }
 0x3c5   : > { %v1298_v58 = vmul.f32 1.442695, %v1297_v57 }
 0x3c7   : > { %2176 = vpow2.f32 %v1298_v58 }
 0x3ca   : > { %v1462_v59 = vpop.xlane.xlu0 %1461 }
 0x3cb   : > { %v1463_v60 = vsub.f32 %v1454_v46, %v1462_v59 }
 0x3cc   : > { %v2175_v61 = vpop.eup %2174 }
 0x3cd   : > { %v1464_v62 = vmul.f32 1.442695, %v1463_v60  ;;  %v1133_v63 = vsel %vm915_vm3, %v2175_v61, 0.0 }
 0x3ce   : > { %1134 = vadd.xlane.f32.xlu0 %v1133_v63 }
 0x3cf   : > { %2178 = vpow2.f32 %v1464_v62 }
 0x3d4   : > { %v2177_v1 = vpop.eup %2176 }
 0x3d5   : > { %v1300_v2 = vsel %vm915_vm3, %v2177_v1, 0.0 }
 0x3d6   : > { %1301 = vadd.xlane.f32.xlu1 %v1300_v2 }
 0x3dc   : > { %v2179_v3 = vpop.eup %2178 }
 0x3dd   : > { %v1466_v4 = vsel %vm915_vm3, %v2179_v3, 0.0 }
 0x3de   : > { %1467 = vadd.xlane.f32.xlu0 %v1466_v4 }
 0x3e7   : > { %1472 = vrot.lane.b32.xlu1 %v871_v32, %s2522_s14 }
 0x3f4   : > { %1306 = vrot.lane.b32.xlu0 %v871_v32, %s2521_s22 }
 0x3fc   : > { %v970_v5 = vpop.xlane.xlu1 %969 }
 0x3fd   : > { %2180 = vrcp.f32 %v970_v5 }
 0x400   : > { %v1141_v7 = vpop.permute.xlu1 %1140 }
 0x401   : > { %v1146_v11 = vsel %vm977_vm4, %v1141_v7, 0 }
 0x40a   : > { %v2181_v6 = vpop.eup %2180 }
 0x40b   : > { %v972_v9 = vmul.f32 %v2181_v6, %v2173_v51 }
 0x40d   : > { %v973_v10 = vpack.c.bf16 %v972_v9, %v972_v9 }
 0x40f   : > { %1949 = vmatmul.mubr.msk.bf16.vlgmr.msra.gmra.mxu0 %vm915_vm3, %v973_v10 }
 0x410   : > { %1959 = vmatpush3.bf16.msra.mxu0 %v1146_v11  ;;  %1960 = vmatprep.mubr.msk.bf16.mxu0 %vm2511_vm0, %v2510_v0 }
 0x411   : > { %1970 = vmatprep.subr.bf16.mxu0 %v2510_v0 }
 0x457   : > { %v1135_v12 = vpop.xlane.xlu0 %1134 }
 0x458   : > { %2182 = vrcp.f32 %v1135_v12 }
 0x45f   : > { %v1302_v13 = vpop.xlane.xlu1 %1301 }
 0x460   : > { %2184 = vrcp.f32 %v1302_v13 }
 0x463   : > { %v1473_v24 = vpop.permute.xlu1 %1472 }
 0x464   : > { %v1478_v26 = vsel %vm977_vm4, %v1473_v24, 0 }
 0x465   : > { %v2183_v15 = vpop.eup %2182 }
 0x466   : > { %v1137_v16 = vmul.f32 %v2183_v15, %v2175_v61 }
 0x467   : > { %v1468_v17 = vpop.xlane.xlu0 %1467 }
 0x468   : > { %2186 = vrcp.f32 %v1468_v17  ;;  %v1138_v19 = vpack.c.bf16 %v1137_v16, %v1137_v16 }
 0x46a   : > { %1961 = vmatmul.mubr.msk.bf16.vlgmr.msra.gmra.mxu0 %vm915_vm3, %v1138_v19 }
 0x46b   : > { %v1307_v20 = vpop.permute.xlu0 %1306  ;;  %1972 = vmatprep.mubr.msk.bf16.mxu0 %vm2511_vm0, %v2510_v0 }
 0x46c   : > { %v1312_v21 = vsel %vm977_vm4, %v1307_v20, 0 }
 0x46d   : > { %v2185_v22 = vpop.eup %2184  ;;  %1971 = vmatpush3.bf16.msra.mxu0 %v1312_v21 }
 0x46e   : > { %1982 = vmatprep.subr.bf16.mxu0 %v2510_v0  ;;  %v1304_v23 = vmul.f32 %v2185_v22, %v2177_v1 }
 0x470   : > { %v1305_v25 = vpack.c.bf16 %v1304_v23, %v1304_v23 }
 0x472   : > { %1973 = vmatmul.mubr.msk.bf16.vlgmr.msra.gmra.mxu0 %vm915_vm3, %v1305_v25 }
 0x473   : > { %1983 = vmatpush3.bf16.msra.mxu0 %v1478_v26  ;;  %1984 = vmatprep.mubr.msk.bf16.mxu0 %vm2511_vm0, %v2510_v0 }
 0x475   : > { %v2187_v27 = vpop.eup %2186 }
 0x476   : > { %v1470_v28 = vmul.f32 %v2187_v27, %v2179_v3 }
 0x478   : > { %v1471_v29 = vpack.c.bf16 %v1470_v28, %v1470_v28 }
 0x47a   : > { %1985 = vmatmul.mubr.msk.bf16.vlgmr.msra.gmra.mxu0 %vm915_vm3, %v1471_v29 }
 0x4cf   : > { %v1015_v30 = vpop.f32.mrf.mxu0 }
 0x4d1   : > { %v1950_v31 = vpop.f32.mrf.mxu0 }
 0x4d3   : > { %v1018_v32 = vpop.f32.mrf.mxu0 }
 0x4d5   : > { %v1951_v33 = vpop.f32.mrf.mxu0 }
 0x52a   : > { %v1182_v34 = vpop.f32.mrf.mxu0 }
 0x52b   : > { %1521 = vrot.lane.b32.xlu1 %v1182_v34, %s2514_s4 }
 0x52c   : > { %v1962_v35 = vpop.f32.mrf.mxu0 }
 0x52e   : > { %v1185_v36 = vpop.f32.mrf.mxu0 }
 0x530   : > { %v1963_v37 = vpop.f32.mrf.mxu0 }
 0x532   : > { %v1348_v39 = vpop.f32.mrf.mxu0 }
 0x533   : > { %1525 = vrot.lane.b32.xlu0 %v1348_v39, %s2515_s17 }
 0x534   : > { %v1974_v41 = vpop.f32.mrf.mxu0 }
 0x536   : > { %v1351_v42 = vpop.f32.mrf.mxu0 }
 0x538   : > { %v1975_v43 = vpop.f32.mrf.mxu0 }
 0x53a   : > { %v1514_v44 = vpop.f32.mrf.mxu0 }
 0x53b   : > { %1529 = vrot.lane.b32.xlu1 %v1514_v44, %s2517_s25  ;;  %s3010_s25 = scalar_lea.hbm %s3133_s13, %s1885_s1 }
 0x53c   : > { %v1986_v45 = vpop.f32.mrf.mxu0 }
 0x53e   : > { %v1517_v46 = vpop.f32.mrf.mxu0 }
 0x540   : > { %v1987_v14 = vpop.f32.mrf.mxu0 }
 0x59d   : > { %v1522_v47 = vpop.permute.xlu1 %1521 }
 0x59e   : > { %v1532_v49 = vsel %vm915_vm3, %v1015_v30, %v1522_v47 }
 0x5a5   : > { %v1526_v48 = vpop.permute.xlu0 %1525 }
 0x5a6   : > { %v1534_v50 = vsel %vm1533_vm5, %v1532_v49, %v1526_v48 }
 0x5ad   : > { %v1530_v8 = vpop.permute.xlu1 %1529 }
 0x5ae   : > { %v1536_v0 = vsel %vm1535_vm6, %v1534_v50, %v1530_v8 }
 0x5af   : > { %v1537_v18 = vpack.c.bf16 %v1536_v0, %v1536_v0 }
 0x5b1   : > { %1539 = vst.msk [vmem:[#allocation2] sm:$0xf] %vm1538_vm7, %v1537_v18 }
 0x5b8   : > { %v1544_v51 = vld [vmem:[#allocation2] sm:$0xf] }
 0x5b9   : > { %1993 = vmatmul.mubr.msk.bf16.vlgmr.msra.gmra.mxu1 %vm695_vm1, %v1544_v51 }
 0x679   : > { %v1605_v53 = vpop.f32.mrf.mxu1 }
 0x67a   : > { %v1606_v54 = vadd.f32 %v1880_v52, %v1605_v53 }
 0x67b   : > { %v1994_v55 = vpop.f32.mrf.mxu1 }
 0x67c   : > { %1611 = vst.msk [vmem:[%s659_s6] sm:$0xff] %vm695_vm1, %v1606_v54 }
 0x67d   : > { %v1608_v56 = vpop.f32.mrf.mxu1 }
 0x67e   : > { %2415 = shalt.err (!%p2412_p6)
}
 0x67f   : > { %s2416_s22 = scalar_lea.hbm %s3010_s25, 128  ;;  %s2420_s19 = scalar_lea.hbm %s3133_s13, 256 }
 0x680   : > { %p2417_p3 = scmp.ne.s32.totalorder %s3010_s25, %s2416_s22  ;;  %p2421_p13 = scmp.lt.s32.totalorder %s3010_s25, %s3133_s13 }
 0x681   : > { %p2422_p12 = scmp.lt.s32.totalorder %s2420_s19, %s2416_s22 }
 0x682   : > { %p2418_p9 = pnand %p2417_p3, %p3134_p5 }
 0x683   : > { %p2423_p0 = por %p2422_p12, %p2421_p13 }
 0x684   : > { %p2419_p4 = pneg %p2418_p9 }
 0x686   : > { %p2424_p8 = pnand %p2423_p0, %p2419_p4 }
 0x688   : > { %2427 = shalt.err (!%p2424_p8)
}
 0x689   : > { %2022 = dma.vmem_to_hbm [thread:$0]  (%p3134_p5), %s3012_s10, 128, %s3010_s25, %s1613_s15   ;;  %v1995_v57 = vpop.f32.mrf.mxu1 }
 0x68a PF: > { %s3135_s21 = sld [smem:[#allocation24_spill]] }
 0x68b   : > { %s3136_s30 = sld [smem:[#allocation31_spill]] }
 0x68c   : > { %s3137_s1 = sld [smem:[#allocation27_spill]] }
 0x690   : > { %s1638_s6 = sand.u32 1, %s3135_s21  }
 0x691   : > { %p3138_p2 = scmp.ne.s32.totalorder %s3136_s30, 0  ;;  %s1639_s4 = scalar_lea.sflag [#allocation5], %s1638_s6 }
 0x692   : > { %p3139_p7 = scmp.ge.s32.totalorder %s3137_s1, 2 }
 0x694   : > { %p2051_p1 = pnand %p3139_p7, %p3138_p2 }
 0x696   : > { %p2052_p11 = pneg %p2051_p1 }
 0x698   : > { %2473 = dma.done.wait (%p2052_p11), %s1639_s4, 128  }
 0x699   : > { %2475 = vsyncadd (%p2052_p11), %s1639_s4, 4294967168  ;;  %s35_s30 = sadd.s32 1, %s3137_s1   ;;  %s3140_s20 = sld [smem:[#allocation30_spill]] }
 0x69a   : > { %p32_p10 = scmp.ge.s32.totalorder %s35_s30, 4   ;;  %s3141_s28 = sld [smem:[#allocation26_spill]] }
 0x69b   : > { %s3142_s29 = sld [smem:[#allocation28_spill]]  ;;  %s3143_s25 = smov %s2482_s26 }
 0x69c   : > { %s3144_s26 = smov %s2486_s27  ;;  %34 = sbr.rel (!%p32_p10) target bundleno = 18 (0x12), region = 175 }
 0x69f   : > { %s3145_s27 = smov %s3140_s20 }
 0x6a1   :  { %1644 = vsyncpa [#allocation4], 1 }
 0x6a2   :  { %1646 = vsyncpa [#allocation4 + $0x1], 1 }
 0x6a3   :  { %1647 = vsyncpa [#allocation7], 1 }
 0x6a4   :  { %1649 = vsyncpa [#allocation7 + $0x1], 1 }
 0x6a5   :  { %1650 = vsyncpa [#allocation10], 1 }
 0x6a6   :  { %1651 = vsyncpa [#allocation13], 1 }
 0x6a7   :  { %1652 = vsyncpa [#allocation16], 1 }
 0x6a8   :  { %1653 = vsyncpa [#allocation5], 1 }
 0x6a9   :  { %1655 = vsyncpa [#allocation5 + $0x1], 1 }

</bundles_post_ra>
